<compile_context>
chip_gen: v7x
topology: tpu7x:2x2x1
jax: 0.10.0
libtpu: 0.0.40
codegen_flags: <defaults>
</compile_context>

<pallas_src>
import math

import numpy as np
import jax
import jax.numpy as jnp
from jax.experimental import pallas as pl
from jax.experimental.pallas import tpu as pltpu  # noqa: F401  (TPU backend)

# ------------------------- problem sizes (small) ---------------------------
IN_DIM = 32           # in_dim == out_dim (required by the skip connection)
OUT_DIM = 32
N_HEADS = 4
D_K = OUT_DIM // N_HEADS
NUM_TYPES = 2
NUM_RELATIONS = 2
N_NODES = 16
N_EDGES = 64
MAX_LEN = 240
SQRT_DK = math.sqrt(D_K)
LN_EPS = 1e-5


# ------------------------------ fused kernel -------------------------------
def _hgt_fused_kernel(
        # per-edge tensors
        x_src_ref, x_dst_ref, rte_ref, src_oh_ref, dst_oh_ref, rel_oh_ref,
        dst_row_ref, dst_col_ref,
        # per-node tensors
        x_node_ref, type_oh_ref,
        # packed parameters
        w_kv_ref, b_kv_ref, w_q_ref, b_q_ref, w_rte_ref, b_rte_ref,
        rel_att_ref, rel_msg_ref, rel_pri_ref, p_pool_ref, s_exp_ref,
        wa_ref, ba_ref, skip_ref, gamma_ref, beta_ref,
        # output
        out_ref):
    f32 = jnp.float32
    E = x_src_ref.shape[0]
    N = x_node_ref.shape[0]

    # ---------------- message: RTE + packed type-dependent linears ---------
    # source representation + relative temporal encoding (x + Lin(emb(t)))
    src = (x_src_ref[...]
           + jnp.dot(rte_ref[...], w_rte_ref[...], preferred_element_type=f32)
           + b_rte_ref[...])
    dst_x = x_dst_ref[...]

    # one wide matmul for K/V of both source types, one for Q of both target
    # types; the right per-type slab is selected with one-hot masks.
    kv_all = jnp.dot(src, w_kv_ref[...], preferred_element_type=f32) + b_kv_ref[...]
    q_all = jnp.dot(dst_x, w_q_ref[...], preferred_element_type=f32) + b_q_ref[...]

    k = jnp.zeros((E, OUT_DIM), f32)
    v = jnp.zeros((E, OUT_DIM), f32)
    q = jnp.zeros((E, OUT_DIM), f32)
    for t in range(NUM_TYPES):
        sm = src_oh_ref[:, t:t + 1]            # (E, 1) source-type mask
        dm = dst_oh_ref[:, t:t + 1]            # (E, 1) target-type mask
        k = k + sm * kv_all[:, t * OUT_DIM:(t + 1) * OUT_DIM]
        v = v + sm * kv_all[:, (NUM_TYPES + t) * OUT_DIM:(NUM_TYPES + t + 1) * OUT_DIM]
        q = q + dm * q_all[:, t * OUT_DIM:(t + 1) * OUT_DIM]

    # ------ per-relation head-block-diagonal transforms (packed over R) ----
    krel_all = jnp.dot(k, rel_att_ref[...], preferred_element_type=f32)   # (E, R*D)
    msg_all = jnp.dot(v, rel_msg_ref[...], preferred_element_type=f32)    # (E, R*D)
    k_rel = jnp.zeros((E, OUT_DIM), f32)
    msg = jnp.zeros((E, OUT_DIM), f32)
    for r in range(NUM_RELATIONS):
        rm = rel_oh_ref[:, r:r + 1]            # (E, 1) relation mask
        k_rel = k_rel + rm * krel_all[:, r * OUT_DIM:(r + 1) * OUT_DIM]
        msg = msg + rm * msg_all[:, r * OUT_DIM:(r + 1) * OUT_DIM]

    # per-edge relation priors + head-wise dot products -> logits (E, H)
    pri = jnp.dot(rel_oh_ref[...], rel_pri_ref[...], preferred_element_type=f32)
    att = jnp.dot(q * k_rel, p_pool_ref[...], preferred_element_type=f32) * pri / SQRT_DK

    # -------- segment softmax over target nodes, vectorized over heads -----
    # incidence matrices built in-kernel from iota compares against dst ids
    A = (jax.lax.broadcasted_iota(jnp.int32, (N, E), 0)
         == dst_row_ref[...]).astype(f32)                          # (N, E)
    At = (jax.lax.broadcasted_iota(jnp.int32, (E, N), 1)
          == dst_col_ref[...]).astype(f32)                         # (E, N)

    # A global per-head shift yields a mathematically identical softmax (the
    # shift cancels between numerator and the gathered per-target denominator)
    # while staying fully head-vectorized; logits are O(1) so no underflow.
    att_max = jnp.max(att, axis=0, keepdims=True)                  # (1, H)
    ex = jnp.exp(att - att_max)                                    # (E, H)
    den = jnp.dot(A, ex, preferred_element_type=f32)               # (N, H) seg sum
    dg = jnp.dot(At, den, preferred_element_type=f32)              # (E, H) gather
    attn = ex / dg                                                 # softmax per target

    # expand attn over the d_k lanes of each head and scatter-add to targets
    weighted = jnp.dot(attn, s_exp_ref[...], preferred_element_type=f32) * msg
    aggr = jnp.dot(A, weighted, preferred_element_type=f32)        # (N, D)

    # ------------------------------ update ----------------------------------
    # exact (erf) GELU, matching torch.nn.functional.gelu default
    hh = 0.5 * aggr * (1.0 + jax.lax.erf(aggr / jnp.float32(math.sqrt(2.0))))

    # type-dependent a_linear via one packed matmul + one-hot selection
    trans_all = jnp.dot(hh, wa_ref[...], preferred_element_type=f32) + ba_ref[...]
    toh = type_oh_ref[...]                                          # (N, T)
    trans = jnp.zeros((N, OUT_DIM), f32)
    for t in range(NUM_TYPES):
        trans = trans + toh[:, t:t + 1] * trans_all[:, t * OUT_DIM:(t + 1) * OUT_DIM]
    # TODO(synk): nn.Dropout(0.2) on trans omitted (deterministic inference).

    # per-node skip gate / LayerNorm affine params gathered once by type
    alpha = jax.nn.sigmoid(jnp.dot(toh, skip_ref[...], preferred_element_type=f32))
    gamma_n = jnp.dot(toh, gamma_ref[...], preferred_element_type=f32)
    beta_n = jnp.dot(toh, beta_ref[...], preferred_element_type=f32)

    x = x_node_ref[...]
    mixed = trans * alpha + x * (1.0 - alpha)
    mu = jnp.mean(mixed, axis=-1, keepdims=True)
    var = jnp.mean((mixed - mu) ** 2, axis=-1, keepdims=True)
    out_ref[...] = (mixed - mu) / jnp.sqrt(var + LN_EPS) * gamma_n + beta_n


# ------------------------------ wrapper -------------------------------------
def _block_diag(rel):
    """(R, H, dk, dk) -> (R, H*dk, H*dk) block-diagonal."""
    R, H, dk, _ = rel.shape
    out = jnp.zeros((R, H * dk, H * dk), jnp.float32)
    for h in range(H):
        out = out.at[:, h * dk:(h + 1) * dk, h * dk:(h + 1) * dk].set(rel[:, h])
    return out


def _head_pool_matrix_np():
    """(D, H) with P[h*dk + d, h] = 1 — sums within each head via matmul."""
    P = np.zeros((OUT_DIM, N_HEADS), np.float32)
    for h in range(N_HEADS):
        P[h * D_K:(h + 1) * D_K, h] = 1.0
    return P


@jax.jit
def hgt_conv_forward(node_inp, node_type, edge_index, edge_type, edge_time, p):
    src, dst = edge_index[0], edge_index[1]
    E = src.shape[0]
    N = node_inp.shape[0]

    # --- glue: gathers / one-hots (all fused by XLA before the single launch)
    x_src = node_inp[src]
    x_dst = node_inp[dst]
    rte = p["emb_table"][edge_time]
    src_oh = jax.nn.one_hot(node_type[src], NUM_TYPES, dtype=jnp.float32)
    dst_oh = jax.nn.one_hot(node_type[dst], NUM_TYPES, dtype=jnp.float32)
    rel_oh = jax.nn.one_hot(edge_type, NUM_RELATIONS, dtype=jnp.float32)
    type_oh = jax.nn.one_hot(node_type, NUM_TYPES, dtype=jnp.float32)
    dst_row = dst.astype(jnp.int32).reshape(1, E)   # for (N,E) incidence
    dst_col = dst.astype(jnp.int32).reshape(E, 1)   # for (E,N) incidence

    # --- parameter packing (in production done once at parameter-load time) -
    w_kv = jnp.concatenate([p["Wk"][t] for t in range(NUM_TYPES)]
                           + [p["Wv"][t] for t in range(NUM_TYPES)], axis=1)
    b_kv = jnp.concatenate([p["bk"][t] for t in range(NUM_TYPES)]
                           + [p["bv"][t] for t in range(NUM_TYPES)], axis=1)
    w_q = jnp.concatenate([p["Wq"][t] for t in range(NUM_TYPES)], axis=1)
    b_q = jnp.concatenate([p["bq"][t] for t in range(NUM_TYPES)], axis=1)
    rel_att_blk = _block_diag(p["rel_att"])
    rel_msg_blk = _block_diag(p["rel_msg"])
    rel_att_p = jnp.concatenate([rel_att_blk[r] for r in range(NUM_RELATIONS)], axis=1)
    rel_msg_p = jnp.concatenate([rel_msg_blk[r] for r in range(NUM_RELATIONS)], axis=1)
    wa_p = jnp.concatenate([p["Wa"][t] for t in range(NUM_TYPES)], axis=1)
    ba_p = jnp.concatenate([p["ba"][t] for t in range(NUM_TYPES)], axis=1)
    skip_col = p["skip"].reshape(NUM_TYPES, 1)
    gamma_tab = p["gamma"].reshape(NUM_TYPES, OUT_DIM)
    beta_tab = p["beta"].reshape(NUM_TYPES, OUT_DIM)
    p_pool_np = _head_pool_matrix_np()
    p_pool = jnp.asarray(p_pool_np)                 # (D, H) head-sum matrix
    s_exp = jnp.asarray(p_pool_np.T)                # (H, D) head-expand matrix

    # Single ungridded pallas_call: whole arrays land in VMEM once, all
    # intermediates (k/q/v, att, msg, attn, aggr) stay on-chip.  No grid means
    # any E/N works (no tail-tile dropping) and no double-buffered weights.
    out = pl.pallas_call(
        _hgt_fused_kernel,
        out_shape=jax.ShapeDtypeStruct((N, OUT_DIM), jnp.float32),
    )(x_src, x_dst, rte, src_oh, dst_oh, rel_oh, dst_row, dst_col,
      node_inp, type_oh,
      w_kv, b_kv, w_q, b_q, p["W_rte"], p["b_rte"],
      rel_att_p, rel_msg_p, p["rel_pri"], p_pool, s_exp,
      wa_p, ba_p, skip_col, gamma_tab, beta_tab)
    return out


# -------------------------- pure-JAX reference ------------------------------
def reference_forward(node_inp, node_type, edge_index, edge_type, edge_time, p):
    src, dst = edge_index[0], edge_index[1]
    E = src.shape[0]
    N = node_inp.shape[0]
    x_src = node_inp[src]
    x_dst = node_inp[dst]
    rte = p["emb_table"][edge_time]
    src_vec = x_src + rte @ p["W_rte"] + p["b_rte"][0]
    st = node_type[src]
    dt = node_type[dst]
    k = jnp.einsum("ed,edo->eo", src_vec, p["Wk"][st]) + p["bk"][st, 0]
    v = jnp.einsum("ed,edo->eo", src_vec, p["Wv"][st]) + p["bv"][st, 0]
    q = jnp.einsum("ed,edo->eo", x_dst, p["Wq"][dt]) + p["bq"][dt, 0]
    k3 = k.reshape(E, N_HEADS, D_K)
    v3 = v.reshape(E, N_HEADS, D_K)
    q3 = q.reshape(E, N_HEADS, D_K)
    k_rel = jnp.einsum("ehd,ehdf->ehf", k3, p["rel_att"][edge_type])
    msg = jnp.einsum("ehd,ehdf->ehf", v3, p["rel_msg"][edge_type])
    att = (q3 * k_rel).sum(-1) * p["rel_pri"][edge_type] / SQRT_DK
    m = jax.ops.segment_max(att, dst, num_segments=N)
    ex = jnp.exp(att - m[dst])
    den = jax.ops.segment_sum(ex, dst, num_segments=N)
    attn = ex / den[dst]
    res = (msg * attn[:, :, None]).reshape(E, OUT_DIM)
    aggr = jax.ops.segment_sum(res, dst, num_segments=N)
    hh = 0.5 * aggr * (1.0 + jax.lax.erf(aggr / math.sqrt(2.0)))
    trans = jnp.einsum("nd,ndo->no", hh, p["Wa"][node_type]) + p["ba"][node_type, 0]
    alpha = jax.nn.sigmoid(p["skip"][:, 0, 0])[node_type][:, None]
    mixed = trans * alpha + node_inp * (1.0 - alpha)
    mu = mixed.mean(-1, keepdims=True)
    var = ((mixed - mu) ** 2).mean(-1, keepdims=True)
    return (mixed - mu) / jnp.sqrt(var + LN_EPS) * p["gamma"][node_type, 0] \
        + p["beta"][node_type, 0]


# -------------------------- parameter init ----------------------------------
def init_params(key):
    ks = jax.random.split(key, 12)
    lin_b = 1.0 / math.sqrt(IN_DIM)

    def u(k, shape, b):
        return jax.random.uniform(k, shape, jnp.float32, -b, b)

    glorot_b = math.sqrt(6.0 / (D_K + D_K))

    position = np.arange(0.0, MAX_LEN)[:, None]
    div_term = np.exp(np.arange(0, IN_DIM, 2) * -(math.log(10000.0) / IN_DIM))
    emb = np.zeros((MAX_LEN, IN_DIM), np.float32)
    emb[:, 0::2] = np.sin(position * div_term) / math.sqrt(IN_DIM)
    emb[:, 1::2] = np.cos(position * div_term) / math.sqrt(IN_DIM)

    return dict(
        Wk=u(ks[0], (NUM_TYPES, IN_DIM, OUT_DIM), lin_b),
        bk=u(ks[1], (NUM_TYPES, 1, OUT_DIM), lin_b),
        Wq=u(ks[2], (NUM_TYPES, IN_DIM, OUT_DIM), lin_b),
        bq=u(ks[3], (NUM_TYPES, 1, OUT_DIM), lin_b),
        Wv=u(ks[4], (NUM_TYPES, IN_DIM, OUT_DIM), lin_b),
        bv=u(ks[5], (NUM_TYPES, 1, OUT_DIM), lin_b),
        Wa=u(ks[6], (NUM_TYPES, OUT_DIM, OUT_DIM), 1.0 / math.sqrt(OUT_DIM)),
        ba=u(ks[7], (NUM_TYPES, 1, OUT_DIM), 1.0 / math.sqrt(OUT_DIM)),
        W_rte=u(ks[8], (IN_DIM, IN_DIM), lin_b),
        b_rte=u(ks[9], (1, IN_DIM), lin_b),
        rel_att=u(ks[10], (NUM_RELATIONS, N_HEADS, D_K, D_K), glorot_b),
        rel_msg=u(ks[11], (NUM_RELATIONS, N_HEADS, D_K, D_K), glorot_b),
        rel_pri=jnp.ones((NUM_RELATIONS, N_HEADS), jnp.float32),
        skip=jnp.ones((NUM_TYPES, 1, 1), jnp.float32),
        gamma=jnp.ones((NUM_TYPES, 1, OUT_DIM), jnp.float32),
        beta=jnp.zeros((NUM_TYPES, 1, OUT_DIM), jnp.float32),
        emb_table=jnp.asarray(emb),
    )


if __name__ == "__main__":
    key = jax.random.PRNGKey(0)
    k_params, k_x, k_nt, k_ei, k_et, k_tm = jax.random.split(key, 6)

    params = init_params(k_params)
    node_inp = jax.random.normal(k_x, (N_NODES, IN_DIM), jnp.float32)
    node_type = jax.random.randint(k_nt, (N_NODES,), 0, NUM_TYPES)
    edge_index = jax.random.randint(k_ei, (2, N_EDGES), 0, N_NODES)
    edge_type = jax.random.randint(k_et, (N_EDGES,), 0, NUM_RELATIONS)
    edge_time = jax.random.randint(k_tm, (N_EDGES,), 0, MAX_LEN)

    out = hgt_conv_forward(node_inp, node_type, edge_index, edge_type,
                           edge_time, params)
    out = jax.block_until_ready(out)

    ref = reference_forward(node_inp, node_type, edge_index, edge_type,
                            edge_time, params)
    ref = jax.block_until_ready(ref)

    assert out.shape == (N_NODES, OUT_DIM)
    assert bool(jnp.allclose(out, ref, atol=2e-3, rtol=2e-3)), \
        f"max abs err = {float(jnp.max(jnp.abs(out - ref)))}"
    print("KERNEL_OK")
</pallas_src>

<mosaic_0001>
module attributes {stable_mosaic.version = 11 : i64} {
  func.func @_hgt_fused_kernel(%arg0: memref<64x32xf32, #tpu.memory_space<vmem>>, %arg1: memref<64x32xf32, #tpu.memory_space<vmem>>, %arg2: memref<64x32xf32, #tpu.memory_space<vmem>>, %arg3: memref<64x2xf32, #tpu.memory_space<vmem>>, %arg4: memref<64x2xf32, #tpu.memory_space<vmem>>, %arg5: memref<64x2xf32, #tpu.memory_space<vmem>>, %arg6: memref<1x64xi32, #tpu.memory_space<vmem>>, %arg7: memref<64x1xi32, #tpu.memory_space<vmem>>, %arg8: memref<16x32xf32, #tpu.memory_space<vmem>>, %arg9: memref<16x2xf32, #tpu.memory_space<vmem>>, %arg10: memref<32x128xf32, #tpu.memory_space<vmem>>, %arg11: memref<1x128xf32, #tpu.memory_space<vmem>>, %arg12: memref<32x64xf32, #tpu.memory_space<vmem>>, %arg13: memref<1x64xf32, #tpu.memory_space<vmem>>, %arg14: memref<32x32xf32, #tpu.memory_space<vmem>>, %arg15: memref<1x32xf32, #tpu.memory_space<vmem>>, %arg16: memref<32x64xf32, #tpu.memory_space<vmem>>, %arg17: memref<32x64xf32, #tpu.memory_space<vmem>>, %arg18: memref<2x4xf32, #tpu.memory_space<vmem>>, %arg19: memref<32x4xf32, #tpu.memory_space<vmem>>, %arg20: memref<4x32xf32, #tpu.memory_space<vmem>>, %arg21: memref<32x64xf32, #tpu.memory_space<vmem>>, %arg22: memref<1x64xf32, #tpu.memory_space<vmem>>, %arg23: memref<2x1xf32, #tpu.memory_space<vmem>>, %arg24: memref<2x32xf32, #tpu.memory_space<vmem>>, %arg25: memref<2x32xf32, #tpu.memory_space<vmem>>, %arg26: memref<16x32xf32, #tpu.memory_space<vmem>>) attributes {dimension_semantics = [], scalar_prefetch = 0 : i64, scratch_operands = 0 : i64, tpu.core_type = #tpu.core_type<tc>} {
    %c0 = arith.constant 0 : index
    %c0_0 = arith.constant 0 : index
    %0 = vector.load %arg0[%c0, %c0_0] : memref<64x32xf32, #tpu.memory_space<vmem>>, vector<64x32xf32>
    %c0_1 = arith.constant 0 : index
    %c0_2 = arith.constant 0 : index
    %1 = vector.load %arg2[%c0_1, %c0_2] : memref<64x32xf32, #tpu.memory_space<vmem>>, vector<64x32xf32>
    %c0_3 = arith.constant 0 : index
    %c0_4 = arith.constant 0 : index
    %2 = vector.load %arg14[%c0_3, %c0_4] : memref<32x32xf32, #tpu.memory_space<vmem>>, vector<32x32xf32>
    %cst = arith.constant dense<0.000000e+00> : vector<64x32xf32>
    %3 = tpu.matmul %1, %2, %cst {dimension_numbers = #tpu.dot_dimension_numbers<[1], [0], [0], [1], [0, 0, 1, 1], [], []>} : vector<64x32xf32>, vector<32x32xf32>, vector<64x32xf32> -> vector<64x32xf32>
    %4 = arith.addf %0, %3 : vector<64x32xf32>
    %c0_5 = arith.constant 0 : index
    %c0_6 = arith.constant 0 : index
    %5 = vector.load %arg15[%c0_5, %c0_6] : memref<1x32xf32, #tpu.memory_space<vmem>>, vector<1x32xf32>
    %6 = vector.broadcast %5 : vector<1x32xf32> to vector<64x32xf32>
    %7 = arith.addf %4, %6 : vector<64x32xf32>
    %c0_7 = arith.constant 0 : index
    %c0_8 = arith.constant 0 : index
    %8 = vector.load %arg1[%c0_7, %c0_8] : memref<64x32xf32, #tpu.memory_space<vmem>>, vector<64x32xf32>
    %c0_9 = arith.constant 0 : index
    %c0_10 = arith.constant 0 : index
    %9 = vector.load %arg10[%c0_9, %c0_10] : memref<32x128xf32, #tpu.memory_space<vmem>>, vector<32x128xf32>
    %cst_11 = arith.constant dense<0.000000e+00> : vector<64x128xf32>
    %10 = tpu.matmul %7, %9, %cst_11 {dimension_numbers = #tpu.dot_dimension_numbers<[1], [0], [0], [1], [0, 0, 1, 1], [], []>} : vector<64x32xf32>, vector<32x128xf32>, vector<64x128xf32> -> vector<64x128xf32>
    %c0_12 = arith.constant 0 : index
    %c0_13 = arith.constant 0 : index
    %11 = vector.load %arg11[%c0_12, %c0_13] : memref<1x128xf32, #tpu.memory_space<vmem>>, vector<1x128xf32>
    %12 = vector.broadcast %11 : vector<1x128xf32> to vector<64x128xf32>
    %13 = arith.addf %10, %12 : vector<64x128xf32>
    %c0_14 = arith.constant 0 : index
    %c0_15 = arith.constant 0 : index
    %14 = vector.load %arg12[%c0_14, %c0_15] : memref<32x64xf32, #tpu.memory_space<vmem>>, vector<32x64xf32>
    %cst_16 = arith.constant dense<0.000000e+00> : vector<64x64xf32>
    %15 = tpu.matmul %8, %14, %cst_16 {dimension_numbers = #tpu.dot_dimension_numbers<[1], [0], [0], [1], [0, 0, 1, 1], [], []>} : vector<64x32xf32>, vector<32x64xf32>, vector<64x64xf32> -> vector<64x64xf32>
    %c0_17 = arith.constant 0 : index
    %c0_18 = arith.constant 0 : index
    %16 = vector.load %arg13[%c0_17, %c0_18] : memref<1x64xf32, #tpu.memory_space<vmem>>, vector<1x64xf32>
    %17 = vector.broadcast %16 : vector<1x64xf32> to vector<64x64xf32>
    %18 = arith.addf %15, %17 : vector<64x64xf32>
    %cst_19 = arith.constant 0.000000e+00 : f32
    %19 = vector.broadcast %cst_19 : f32 to vector<64x32xf32>
    %cst_20 = arith.constant 0.000000e+00 : f32
    %20 = vector.broadcast %cst_20 : f32 to vector<64x32xf32>
    %cst_21 = arith.constant 0.000000e+00 : f32
    %21 = vector.broadcast %cst_21 : f32 to vector<64x32xf32>
    %c0_22 = arith.constant 0 : index
    %c0_23 = arith.constant 0 : index
    %22 = vector.load %arg3[%c0_22, %c0_23] : memref<64x2xf32, #tpu.memory_space<vmem>>, vector<64x1xf32>
    %c0_24 = arith.constant 0 : index
    %c0_25 = arith.constant 0 : index
    %23 = vector.load %arg4[%c0_24, %c0_25] : memref<64x2xf32, #tpu.memory_space<vmem>>, vector<64x1xf32>
    %24 = vector.extract_strided_slice %13 {offsets = [0, 0], sizes = [64, 32], strides = [1, 1]} : vector<64x128xf32> to vector<64x32xf32>
    %25 = vector.broadcast %22 : vector<64x1xf32> to vector<64x32xf32>
    %26 = arith.mulf %25, %24 : vector<64x32xf32>
    %27 = arith.addf %19, %26 : vector<64x32xf32>
    %28 = vector.extract_strided_slice %13 {offsets = [0, 64], sizes = [64, 32], strides = [1, 1]} : vector<64x128xf32> to vector<64x32xf32>
    %29 = vector.broadcast %22 : vector<64x1xf32> to vector<64x32xf32>
    %30 = arith.mulf %29, %28 : vector<64x32xf32>
    %31 = arith.addf %20, %30 : vector<64x32xf32>
    %32 = vector.extract_strided_slice %18 {offsets = [0, 0], sizes = [64, 32], strides = [1, 1]} : vector<64x64xf32> to vector<64x32xf32>
    %33 = vector.broadcast %23 : vector<64x1xf32> to vector<64x32xf32>
    %34 = arith.mulf %33, %32 : vector<64x32xf32>
    %35 = arith.addf %21, %34 : vector<64x32xf32>
    %c0_26 = arith.constant 0 : index
    %c1 = arith.constant 1 : index
    %36 = vector.load %arg3[%c0_26, %c1] : memref<64x2xf32, #tpu.memory_space<vmem>>, vector<64x1xf32>
    %c0_27 = arith.constant 0 : index
    %c1_28 = arith.constant 1 : index
    %37 = vector.load %arg4[%c0_27, %c1_28] : memref<64x2xf32, #tpu.memory_space<vmem>>, vector<64x1xf32>
    %38 = vector.extract_strided_slice %13 {offsets = [0, 32], sizes = [64, 32], strides = [1, 1]} : vector<64x128xf32> to vector<64x32xf32>
    %39 = vector.broadcast %36 : vector<64x1xf32> to vector<64x32xf32>
    %40 = arith.mulf %39, %38 : vector<64x32xf32>
    %41 = arith.addf %27, %40 : vector<64x32xf32>
    %42 = vector.extract_strided_slice %13 {offsets = [0, 96], sizes = [64, 32], strides = [1, 1]} : vector<64x128xf32> to vector<64x32xf32>
    %43 = vector.broadcast %36 : vector<64x1xf32> to vector<64x32xf32>
    %44 = arith.mulf %43, %42 : vector<64x32xf32>
    %45 = arith.addf %31, %44 : vector<64x32xf32>
    %46 = vector.extract_strided_slice %18 {offsets = [0, 32], sizes = [64, 32], strides = [1, 1]} : vector<64x64xf32> to vector<64x32xf32>
    %47 = vector.broadcast %37 : vector<64x1xf32> to vector<64x32xf32>
    %48 = arith.mulf %47, %46 : vector<64x32xf32>
    %49 = arith.addf %35, %48 : vector<64x32xf32>
    %c0_29 = arith.constant 0 : index
    %c0_30 = arith.constant 0 : index
    %50 = vector.load %arg16[%c0_29, %c0_30] : memref<32x64xf32, #tpu.memory_space<vmem>>, vector<32x64xf32>
    %cst_31 = arith.constant dense<0.000000e+00> : vector<64x64xf32>
    %51 = tpu.matmul %41, %50, %cst_31 {dimension_numbers = #tpu.dot_dimension_numbers<[1], [0], [0], [1], [0, 0, 1, 1], [], []>} : vector<64x32xf32>, vector<32x64xf32>, vector<64x64xf32> -> vector<64x64xf32>
    %c0_32 = arith.constant 0 : index
    %c0_33 = arith.constant 0 : index
    %52 = vector.load %arg17[%c0_32, %c0_33] : memref<32x64xf32, #tpu.memory_space<vmem>>, vector<32x64xf32>
    %cst_34 = arith.constant dense<0.000000e+00> : vector<64x64xf32>
    %53 = tpu.matmul %45, %52, %cst_34 {dimension_numbers = #tpu.dot_dimension_numbers<[1], [0], [0], [1], [0, 0, 1, 1], [], []>} : vector<64x32xf32>, vector<32x64xf32>, vector<64x64xf32> -> vector<64x64xf32>
    %cst_35 = arith.constant 0.000000e+00 : f32
    %54 = vector.broadcast %cst_35 : f32 to vector<64x32xf32>
    %cst_36 = arith.constant 0.000000e+00 : f32
    %55 = vector.broadcast %cst_36 : f32 to vector<64x32xf32>
    %c0_37 = arith.constant 0 : index
    %c0_38 = arith.constant 0 : index
    %56 = vector.load %arg5[%c0_37, %c0_38] : memref<64x2xf32, #tpu.memory_space<vmem>>, vector<64x1xf32>
    %57 = vector.extract_strided_slice %51 {offsets = [0, 0], sizes = [64, 32], strides = [1, 1]} : vector<64x64xf32> to vector<64x32xf32>
    %58 = vector.broadcast %56 : vector<64x1xf32> to vector<64x32xf32>
    %59 = arith.mulf %58, %57 : vector<64x32xf32>
    %60 = arith.addf %54, %59 : vector<64x32xf32>
    %61 = vector.extract_strided_slice %53 {offsets = [0, 0], sizes = [64, 32], strides = [1, 1]} : vector<64x64xf32> to vector<64x32xf32>
    %62 = vector.broadcast %56 : vector<64x1xf32> to vector<64x32xf32>
    %63 = arith.mulf %62, %61 : vector<64x32xf32>
    %64 = arith.addf %55, %63 : vector<64x32xf32>
    %c0_39 = arith.constant 0 : index
    %c1_40 = arith.constant 1 : index
    %65 = vector.load %arg5[%c0_39, %c1_40] : memref<64x2xf32, #tpu.memory_space<vmem>>, vector<64x1xf32>
    %66 = vector.extract_strided_slice %51 {offsets = [0, 32], sizes = [64, 32], strides = [1, 1]} : vector<64x64xf32> to vector<64x32xf32>
    %67 = vector.broadcast %65 : vector<64x1xf32> to vector<64x32xf32>
    %68 = arith.mulf %67, %66 : vector<64x32xf32>
    %69 = arith.addf %60, %68 : vector<64x32xf32>
    %70 = vector.extract_strided_slice %53 {offsets = [0, 32], sizes = [64, 32], strides = [1, 1]} : vector<64x64xf32> to vector<64x32xf32>
    %71 = vector.broadcast %65 : vector<64x1xf32> to vector<64x32xf32>
    %72 = arith.mulf %71, %70 : vector<64x32xf32>
    %73 = arith.addf %64, %72 : vector<64x32xf32>
    %c0_41 = arith.constant 0 : index
    %c0_42 = arith.constant 0 : index
    %74 = vector.load %arg5[%c0_41, %c0_42] : memref<64x2xf32, #tpu.memory_space<vmem>>, vector<64x2xf32>
    %c0_43 = arith.constant 0 : index
    %c0_44 = arith.constant 0 : index
    %75 = vector.load %arg18[%c0_43, %c0_44] : memref<2x4xf32, #tpu.memory_space<vmem>>, vector<2x4xf32>
    %cst_45 = arith.constant dense<0.000000e+00> : vector<64x4xf32>
    %76 = tpu.matmul %74, %75, %cst_45 {dimension_numbers = #tpu.dot_dimension_numbers<[1], [0], [0], [1], [0, 0, 1, 1], [], []>} : vector<64x2xf32>, vector<2x4xf32>, vector<64x4xf32> -> vector<64x4xf32>
    %77 = arith.mulf %49, %69 : vector<64x32xf32>
    %c0_46 = arith.constant 0 : index
    %c0_47 = arith.constant 0 : index
    %78 = vector.load %arg19[%c0_46, %c0_47] : memref<32x4xf32, #tpu.memory_space<vmem>>, vector<32x4xf32>
    %cst_48 = arith.constant dense<0.000000e+00> : vector<64x4xf32>
    %79 = tpu.matmul %77, %78, %cst_48 {dimension_numbers = #tpu.dot_dimension_numbers<[1], [0], [0], [1], [0, 0, 1, 1], [], []>} : vector<64x32xf32>, vector<32x4xf32>, vector<64x4xf32> -> vector<64x4xf32>
    %80 = arith.mulf %79, %76 : vector<64x4xf32>
    %cst_49 = arith.constant 2.82842708 : f32
    %81 = vector.broadcast %cst_49 : f32 to vector<64x4xf32>
    %82 = arith.divf %80, %81 : vector<64x4xf32>
    %83 = tpu.iota {dimensions = array<i32: 0>} : vector<16x64xi32>
    %c0_50 = arith.constant 0 : index
    %c0_51 = arith.constant 0 : index
    %84 = vector.load %arg6[%c0_50, %c0_51] : memref<1x64xi32, #tpu.memory_space<vmem>>, vector<1x64xi32>
    %85 = vector.broadcast %84 : vector<1x64xi32> to vector<16x64xi32>
    %86 = arith.cmpi eq, %83, %85 : vector<16x64xi32>
    %87 = arith.extui %86 : vector<16x64xi1> to vector<16x64xi32>
    %88 = arith.sitofp %87 : vector<16x64xi32> to vector<16x64xf32>
    %89 = tpu.iota {dimensions = array<i32: 1>} : vector<64x16xi32>
    %c0_52 = arith.constant 0 : index
    %c0_53 = arith.constant 0 : index
    %90 = vector.load %arg7[%c0_52, %c0_53] : memref<64x1xi32, #tpu.memory_space<vmem>>, vector<64x1xi32>
    %91 = vector.broadcast %90 : vector<64x1xi32> to vector<64x16xi32>
    %92 = arith.cmpi eq, %89, %91 : vector<64x16xi32>
    %93 = arith.extui %92 : vector<64x16xi1> to vector<64x16xi32>
    %94 = arith.sitofp %93 : vector<64x16xi32> to vector<64x16xf32>
    %cst_54 = arith.constant dense<0xFF800000> : vector<4xf32>
    %95 = vector.multi_reduction <maximumf>, %82, %cst_54 [0] : vector<64x4xf32> to vector<4xf32>
    %96 = vector.shape_cast %95 : vector<4xf32> to vector<1x4xf32>
    %97 = vector.broadcast %96 : vector<1x4xf32> to vector<64x4xf32>
    %98 = arith.subf %82, %97 : vector<64x4xf32>
    %99 = math.exp %98 : vector<64x4xf32>
    %cst_55 = arith.constant dense<0.000000e+00> : vector<16x4xf32>
    %100 = tpu.matmul %88, %99, %cst_55 {dimension_numbers = #tpu.dot_dimension_numbers<[1], [0], [0], [1], [0, 0, 1, 1], [], []>} : vector<16x64xf32>, vector<64x4xf32>, vector<16x4xf32> -> vector<16x4xf32>
    %cst_56 = arith.constant dense<0.000000e+00> : vector<64x4xf32>
    %101 = tpu.matmul %94, %100, %cst_56 {dimension_numbers = #tpu.dot_dimension_numbers<[1], [0], [0], [1], [0, 0, 1, 1], [], []>} : vector<64x16xf32>, vector<16x4xf32>, vector<64x4xf32> -> vector<64x4xf32>
    %102 = arith.divf %99, %101 : vector<64x4xf32>
    %c0_57 = arith.constant 0 : index
    %c0_58 = arith.constant 0 : index
    %103 = vector.load %arg20[%c0_57, %c0_58] : memref<4x32xf32, #tpu.memory_space<vmem>>, vector<4x32xf32>
    %cst_59 = arith.constant dense<0.000000e+00> : vector<64x32xf32>
    %104 = tpu.matmul %102, %103, %cst_59 {dimension_numbers = #tpu.dot_dimension_numbers<[1], [0], [0], [1], [0, 0, 1, 1], [], []>} : vector<64x4xf32>, vector<4x32xf32>, vector<64x32xf32> -> vector<64x32xf32>
    %105 = arith.mulf %104, %73 : vector<64x32xf32>
    %cst_60 = arith.constant dense<0.000000e+00> : vector<16x32xf32>
    %106 = tpu.matmul %88, %105, %cst_60 {dimension_numbers = #tpu.dot_dimension_numbers<[1], [0], [0], [1], [0, 0, 1, 1], [], []>} : vector<16x64xf32>, vector<64x32xf32>, vector<16x32xf32> -> vector<16x32xf32>
    %cst_61 = arith.constant 5.000000e-01 : f32
    %107 = vector.broadcast %cst_61 : f32 to vector<16x32xf32>
    %108 = arith.mulf %107, %106 : vector<16x32xf32>
    %cst_62 = arith.constant 1.41421354 : f32
    %109 = vector.broadcast %cst_62 : f32 to vector<16x32xf32>
    %110 = arith.divf %106, %109 : vector<16x32xf32>
    %111 = math.erf %110 : vector<16x32xf32>
    %cst_63 = arith.constant 1.000000e+00 : f32
    %112 = vector.broadcast %cst_63 : f32 to vector<16x32xf32>
    %113 = arith.addf %112, %111 : vector<16x32xf32>
    %114 = arith.mulf %108, %113 : vector<16x32xf32>
    %c0_64 = arith.constant 0 : index
    %c0_65 = arith.constant 0 : index
    %115 = vector.load %arg21[%c0_64, %c0_65] : memref<32x64xf32, #tpu.memory_space<vmem>>, vector<32x64xf32>
    %cst_66 = arith.constant dense<0.000000e+00> : vector<16x64xf32>
    %116 = tpu.matmul %114, %115, %cst_66 {dimension_numbers = #tpu.dot_dimension_numbers<[1], [0], [0], [1], [0, 0, 1, 1], [], []>} : vector<16x32xf32>, vector<32x64xf32>, vector<16x64xf32> -> vector<16x64xf32>
    %c0_67 = arith.constant 0 : index
    %c0_68 = arith.constant 0 : index
    %117 = vector.load %arg22[%c0_67, %c0_68] : memref<1x64xf32, #tpu.memory_space<vmem>>, vector<1x64xf32>
    %118 = vector.broadcast %117 : vector<1x64xf32> to vector<16x64xf32>
    %119 = arith.addf %116, %118 : vector<16x64xf32>
    %c0_69 = arith.constant 0 : index
    %c0_70 = arith.constant 0 : index
    %120 = vector.load %arg9[%c0_69, %c0_70] : memref<16x2xf32, #tpu.memory_space<vmem>>, vector<16x2xf32>
    %cst_71 = arith.constant 0.000000e+00 : f32
    %121 = vector.broadcast %cst_71 : f32 to vector<16x32xf32>
    %122 = vector.extract_strided_slice %120 {offsets = [0, 0], sizes = [16, 1], strides = [1, 1]} : vector<16x2xf32> to vector<16x1xf32>
    %123 = vector.extract_strided_slice %119 {offsets = [0, 0], sizes = [16, 32], strides = [1, 1]} : vector<16x64xf32> to vector<16x32xf32>
    %124 = vector.broadcast %122 : vector<16x1xf32> to vector<16x32xf32>
    %125 = arith.mulf %124, %123 : vector<16x32xf32>
    %126 = arith.addf %121, %125 : vector<16x32xf32>
    %127 = vector.extract_strided_slice %120 {offsets = [0, 1], sizes = [16, 1], strides = [1, 1]} : vector<16x2xf32> to vector<16x1xf32>
    %128 = vector.extract_strided_slice %119 {offsets = [0, 32], sizes = [16, 32], strides = [1, 1]} : vector<16x64xf32> to vector<16x32xf32>
    %129 = vector.broadcast %127 : vector<16x1xf32> to vector<16x32xf32>
    %130 = arith.mulf %129, %128 : vector<16x32xf32>
    %131 = arith.addf %126, %130 : vector<16x32xf32>
    %c0_72 = arith.constant 0 : index
    %c0_73 = arith.constant 0 : index
    %132 = vector.load %arg23[%c0_72, %c0_73] : memref<2x1xf32, #tpu.memory_space<vmem>>, vector<2x1xf32>
    %cst_74 = arith.constant dense<0.000000e+00> : vector<16x1xf32>
    %133 = tpu.matmul %120, %132, %cst_74 {dimension_numbers = #tpu.dot_dimension_numbers<[1], [0], [0], [1], [0, 0, 1, 1], [], []>} : vector<16x2xf32>, vector<2x1xf32>, vector<16x1xf32> -> vector<16x1xf32>
    %134 = arith.negf %133 : vector<16x1xf32>
    %135 = math.exp %134 : vector<16x1xf32>
    %cst_75 = arith.constant 1.000000e+00 : f32
    %136 = vector.broadcast %cst_75 : f32 to vector<16x1xf32>
    %137 = arith.addf %136, %135 : vector<16x1xf32>
    %138 = arith.divf %136, %137 : vector<16x1xf32>
    %c0_76 = arith.constant 0 : index
    %c0_77 = arith.constant 0 : index
    %139 = vector.load %arg24[%c0_76, %c0_77] : memref<2x32xf32, #tpu.memory_space<vmem>>, vector<2x32xf32>
    %cst_78 = arith.constant dense<0.000000e+00> : vector<16x32xf32>
    %140 = tpu.matmul %120, %139, %cst_78 {dimension_numbers = #tpu.dot_dimension_numbers<[1], [0], [0], [1], [0, 0, 1, 1], [], []>} : vector<16x2xf32>, vector<2x32xf32>, vector<16x32xf32> -> vector<16x32xf32>
    %c0_79 = arith.constant 0 : index
    %c0_80 = arith.constant 0 : index
    %141 = vector.load %arg25[%c0_79, %c0_80] : memref<2x32xf32, #tpu.memory_space<vmem>>, vector<2x32xf32>
    %cst_81 = arith.constant dense<0.000000e+00> : vector<16x32xf32>
    %142 = tpu.matmul %120, %141, %cst_81 {dimension_numbers = #tpu.dot_dimension_numbers<[1], [0], [0], [1], [0, 0, 1, 1], [], []>} : vector<16x2xf32>, vector<2x32xf32>, vector<16x32xf32> -> vector<16x32xf32>
    %c0_82 = arith.constant 0 : index
    %c0_83 = arith.constant 0 : index
    %143 = vector.load %arg8[%c0_82, %c0_83] : memref<16x32xf32, #tpu.memory_space<vmem>>, vector<16x32xf32>
    %144 = vector.broadcast %138 : vector<16x1xf32> to vector<16x32xf32>
    %145 = arith.mulf %131, %144 : vector<16x32xf32>
    %cst_84 = arith.constant 1.000000e+00 : f32
    %146 = vector.broadcast %cst_84 : f32 to vector<16x1xf32>
    %147 = arith.subf %146, %138 : vector<16x1xf32>
    %148 = vector.broadcast %147 : vector<16x1xf32> to vector<16x32xf32>
    %149 = arith.mulf %143, %148 : vector<16x32xf32>
    %150 = arith.addf %145, %149 : vector<16x32xf32>
    %cst_85 = arith.constant dense<0.000000e+00> : vector<16xf32>
    %151 = vector.multi_reduction <add>, %150, %cst_85 [1] : vector<16x32xf32> to vector<16xf32>
    %152 = vector.shape_cast %151 : vector<16xf32> to vector<16x1xf32>
    %cst_86 = arith.constant 3.200000e+01 : f32
    %153 = vector.broadcast %cst_86 : f32 to vector<16x1xf32>
    %154 = arith.divf %152, %153 : vector<16x1xf32>
    %155 = vector.broadcast %154 : vector<16x1xf32> to vector<16x32xf32>
    %156 = arith.subf %150, %155 : vector<16x32xf32>
    %157 = arith.mulf %156, %156 : vector<16x32xf32>
    %cst_87 = arith.constant dense<0.000000e+00> : vector<16xf32>
    %158 = vector.multi_reduction <add>, %157, %cst_87 [1] : vector<16x32xf32> to vector<16xf32>
    %159 = vector.shape_cast %158 : vector<16xf32> to vector<16x1xf32>
    %cst_88 = arith.constant 3.200000e+01 : f32
    %160 = vector.broadcast %cst_88 : f32 to vector<16x1xf32>
    %161 = arith.divf %159, %160 : vector<16x1xf32>
    %162 = vector.broadcast %154 : vector<16x1xf32> to vector<16x32xf32>
    %163 = arith.subf %150, %162 : vector<16x32xf32>
    %cst_89 = arith.constant 9.99999974E-6 : f32
    %164 = vector.broadcast %cst_89 : f32 to vector<16x1xf32>
    %165 = arith.addf %161, %164 : vector<16x1xf32>
    %166 = math.sqrt %165 : vector<16x1xf32>
    %167 = vector.broadcast %166 : vector<16x1xf32> to vector<16x32xf32>
    %168 = arith.divf %163, %167 : vector<16x32xf32>
    %169 = arith.mulf %168, %140 : vector<16x32xf32>
    %170 = arith.addf %169, %142 : vector<16x32xf32>
    %c0_90 = arith.constant 0 : index
    %c0_91 = arith.constant 0 : index
    %171 = vector.load %arg26[%c0_90, %c0_91] : memref<16x32xf32, #tpu.memory_space<vmem>>, vector<16x32xf32>
    tpu.vector_store %arg26[%c0_90, %c0_91], %170 {strides = array<i32>} : memref<16x32xf32, #tpu.memory_space<vmem>>, vector<16x32xf32>,
    return
  }
}

</mosaic_0001>

<bundles_post_ra>
// kernel: hgt_conv_forward.1
= control target key start
LH: loop header
LB: loop body
LE: loop exit
PB: predicated region body
PF: predicated region fallthrough
CT: control target
= control target key end

     0   :  { %s4234_s0 = inlined_call_operand.vmem [shape: f32[64,32], index: 0, kind: input, shape index: {}]   ;;  %s4235_s1 = inlined_call_operand.vmem [shape: f32[64,32], index: 1, kind: input, shape index: {}]   ;;  %s4236_s2 = inlined_call_operand.vmem [shape: f32[64,32], index: 2, kind: input, shape index: {}]   ;;  %s4237_s3 = inlined_call_operand.vmem [shape: f32[64,2], index: 3, kind: input, shape index: {}]   ;;  %s4238_s4 = inlined_call_operand.vmem [shape: f32[64,2], index: 4, kind: input, shape index: {}]   ;;  %s4239_s5 = inlined_call_operand.vmem [shape: f32[64,2], index: 5, kind: input, shape index: {}]   ;;  %s4240_s6 = inlined_call_operand.vmem [shape: s32[1,64], index: 6, kind: input, shape index: {}]   ;;  %s4241_s7 = inlined_call_operand.vmem [shape: s32[64,1], index: 7, kind: input, shape index: {}]   ;;  %s4242_s8 = inlined_call_operand.vmem [shape: f32[16,32], index: 8, kind: input, shape index: {}]   ;;  %s4243_s9 = inlined_call_operand.vmem [shape: f32[16,2], index: 9, kind: input, shape index: {}]   ;;  %s4244_s10 = inlined_call_operand.vmem [shape: f32[32,128], index: 10, kind: input, shape index: {}]   ;;  %s4245_s11 = inlined_call_operand.vmem [shape: f32[1,128], index: 11, kind: input, shape index: {}]   ;;  %s4246_s12 = inlined_call_operand.vmem [shape: f32[32,64], index: 12, kind: input, shape index: {}]   ;;  %s4247_s13 = inlined_call_operand.vmem [shape: f32[1,64], index: 13, kind: input, shape index: {}]   ;;  %s4248_s14 = inlined_call_operand.vmem [shape: f32[32,32], index: 14, kind: input, shape index: {}]   ;;  %s4249_s15 = inlined_call_operand.vmem [shape: f32[1,32], index: 15, kind: input, shape index: {}]   ;;  %s4250_s16 = inlined_call_operand.vmem [shape: f32[32,64], index: 16, kind: input, shape index: {}]   ;;  %s4251_s17 = inlined_call_operand.vmem [shape: f32[32,64], index: 17, kind: input, shape index: {}]   ;;  %s4252_s18 = inlined_call_operand.vmem [shape: f32[2,4], index: 18, kind: input, shape index: {}]   ;;  %s4253_s19 = inlined_call_operand.vmem [shape: f32[32,4], index: 19, kind: input, shape index: {}]   ;;  %s4254_s20 = inlined_call_operand.vmem [shape: f32[4,32], index: 20, kind: input, shape index: {}]   ;;  %s4255_s21 = inlined_call_operand.vmem [shape: f32[32,64], index: 21, kind: input, shape index: {}]   ;;  %s4256_s22 = inlined_call_operand.vmem [shape: f32[1,64], index: 22, kind: input, shape index: {}]   ;;  %s4257_s23 = inlined_call_operand.vmem [shape: f32[2,1], index: 23, kind: input, shape index: {}]   ;;  %s4258_s24 = inlined_call_operand.vmem [shape: f32[2,32], index: 24, kind: input, shape index: {}]   ;;  %s4259_s25 = inlined_call_operand.vmem [shape: f32[2,32], index: 25, kind: input, shape index: {}]   ;;  %s4260_s26 = inlined_call_operand.hbm [shape: f32[16,32], index: 26, kind: output, shape index: {}]  }
   0x1   :  { %4271 = sst [smem:[#allocation5_spill]] %s4234_s0 }
   0x2   :  { %4272 = sst [smem:[#allocation6_spill]] %s4235_s1 }
   0x3   :  { %4273 = sst [smem:[#allocation7_spill]] %s4236_s2 }
   0x4   :  { %4274 = sst [smem:[#allocation8_spill]] %s4237_s3 }
   0x5   :  { %4275 = sst [smem:[#allocation9_spill]] %s4238_s4 }
   0x6   :  { %4276 = sst [smem:[#allocation10_spill]] %s4239_s5 }
   0x7   :  { %4277 = sst [smem:[#allocation11_spill]] %s4240_s6 }
   0x8   :  { %4278 = sst [smem:[#allocation12_spill]] %s4241_s7 }
   0x9   :  { %4279 = sst [smem:[#allocation13_spill]] %s4242_s8 }
   0xa   :  { %4280 = sst [smem:[#allocation14_spill]] %s4243_s9 }
   0xb   :  { %4281 = sst [smem:[#allocation15_spill]] %s4244_s10 }
   0xc   :  { %v100_v0 = vld [vmem:[%s4248_s14] sm:$0xff]  ;;  %v101_v1 = vld [vmem:[%s4248_s14 + $0x8] sm:$0xff]  ;;  %v102_v2 = vld [vmem:[%s4248_s14 + $0x10] sm:$0xff]  ;;  %vm104_vm0 = vcmask 261120   ;;  %s4282_s2 = sld [smem:[#allocation7_spill]] }
   0xd   :  { %v3117_v3 = vpack.c.bf16 %v101_v1, %v100_v0  ;;  %v103_v4 = vld [vmem:[%s4248_s14 + $0x18] sm:$0xff]  ;;  %s4283_s6 = sld [smem:[#allocation15_spill]] }
   0xe   :  { %v3121_v6 = vpack.c.bf16 %v103_v4, %v102_v2 }
   0xf   :  { %3118 = vmatprep.subr.bf16.mxu0 %v3117_v3 }
  0x10   :  { %3120 = vmatpush3.bf16.msra.mxu0 %v3117_v3 }
  0x11   :  { %3122 = vmatprep.subr.bf16.mxu0 %v3121_v6 }
  0x12   :  { %v92_v5 = vld [vmem:[%s4282_s2] sm:$0xff] }
  0x13   :  { %2897 = vmatprep.mubr.msk.f32.mxu0 %vm104_vm0, %v92_v5  ;;  %v265_v7 = vld [vmem:[%s4283_s6] sm:$0xff]  ;;  %v266_v8 = vld [vmem:[%s4283_s6 + $0x8] sm:$0xff] }
  0x14   :  { %v3125_v9 = vpack.c.bf16 %v266_v8, %v265_v7 }
  0x15   :  { %31 = vsyncpa [#allocation3], 0  ;;  %3124 = vmatpush3.bf16.msra.mxu0 %v3121_v6  ;;  %v93_v10 = vld [vmem:[%s4282_s2 + $0x8] sm:$0xff]  ;;  %v94_v11 = vld [vmem:[%s4282_s2 + $0x10] sm:$0xff]  ;;  %s4284_s29 = sld [smem:[#allocation8_spill]]  ;;  %v3305_v22 = vmov 1  }
  0x16   :  { %3126 = vmatprep.subr.bf16.mxu1 %v3125_v9  ;;  %v95_v12 = vld [vmem:[%s4282_s2 + $0x18] sm:$0xff]  ;;  %v96_v13 = vld [vmem:[%s4282_s2 + $0x20] sm:$0xff]  ;;  %v97_v14 = vld [vmem:[%s4282_s2 + $0x28] sm:$0xff]  ;;  %3218 = vset.pattern.permute.xlu1 %v3305_v22  ;;  %s4285_s9 = sld [smem:[#allocation6_spill]]  ;;  %v3306_v39 = vmov 0   ;;  %s4287_s30 = sld [smem:[#allocation10_spill]] }
  0x17   :  { %3128 = vmatpush3.bf16.msra.mxu1 %v3125_v9  ;;  %v98_v15 = vld [vmem:[%s4282_s2 + $0x30] sm:$0xff]  ;;  %v99_v16 = vld [vmem:[%s4282_s2 + $0x38] sm:$0xff]  ;;  %3217 = vset.pattern.permute.xlu0 %v3305_v22  ;;  %v405_v25 = vld [vmem:[%s4246_s12] sm:$0xff]  ;;  %s4286_s2 = sld [smem:[#allocation5_spill]]  ;;  %vm1333_vm1 = vcmask 1041408   ;;  %vm1316_vm2 = vcmask 15360  }
  0x18   :  { %2898 = vmatmul.mubr.msk.f32.vlgmr.msra.gmra.mrb[0].mxu0 %vm104_vm0, %v93_v10  ;;  %v267_v17 = vld [vmem:[%s4283_s6 + $0x10] sm:$0xff]  ;;  %v268_v18 = vld [vmem:[%s4283_s6 + $0x18] sm:$0xff]  ;;  %v406_v26 = vld [vmem:[%s4246_s12 + $0x8] sm:$0xff]  ;;  %s3308_s6 = smov 64   ;;  %s4290_s28 = sld [smem:[#allocation11_spill]]  ;;  %vm1718_vm3 = vcmask 523264  }
  0x19   :  { %2900 = vmatprep.mubr.msk.f32.mxu0 %vm104_vm0, %v94_v11  ;;  %v3129_v19 = vpack.c.bf16 %v268_v18, %v267_v17  ;;  %v407_v27 = vld [vmem:[%s4246_s12 + $0x10] sm:$0xff]  ;;  %v408_v28 = vld [vmem:[%s4246_s12 + $0x18] sm:$0xff]  ;;  %v3133_v29 = vpack.c.bf16 %v406_v26, %v405_v25  ;;  %v2656_v44 = vld [vmem:[%s4249_s15] ss:$0 sm:$0xff]  ;;  %s4288_s12 = sld [smem:[#allocation9_spill]]  ;;  %vm1672_vm6 = vcmask 31744  }
  0x1a   :  { %v3137_v31 = vpack.c.bf16 %v408_v28, %v407_v27  ;;  %v836_v17 = vld [vmem:[%s4250_s16 + $0x18] sm:$0xff]  ;;  %vm1800_vm8 = vcmask 130048  }
  0x1b   :  { %3130 = vmatprep.subr.bf16.mxu1 %v3129_v19  ;;  %v547_v20 = vld [vmem:[%s4284_s29 + $0x10] sm:$0xff]  ;;  %v545_v21 = vld [vmem:[%s4284_s29] sm:$0xff]  ;;  %v548_v23 = vld [vmem:[%s4284_s29 + $0x18] sm:$0xff]  ;;  %3134 = vmatprep.subr.bf16.mxu0 %v3133_v29 }
  0x1c   :  { %2901 = vmatmul.mubr.msk.f32.gmra.mrb[2].mxu0 %vm104_vm0, %v95_v12  ;;  %3132 = vmatpush3.bf16.msra.mxu1 %v3129_v19  ;;  %v546_v24 = vld [vmem:[%s4284_s29 + $0x8] sm:$0xff]  ;;  %v257_v30 = vld [vmem:[%s4285_s9] sm:$0xff]  ;;  %v552_v34 = vld [vmem:[%s4284_s29 + $0x38] sm:$0xff] }
  0x1d   :  { %2903 = vmatprep.mubr.msk.f32.mxu0 %vm104_vm0, %v96_v13  ;;  %682 = vperm.xlu1 %3218, %v547_v20   ;;  %v550_v32 = vld [vmem:[%s4284_s29 + $0x28] sm:$0xff]  ;;  %v549_v33 = vld [vmem:[%s4284_s29 + $0x20] sm:$0xff]  ;;  %v551_v35 = vld [vmem:[%s4284_s29 + $0x30] sm:$0xff] }
  0x1e   :  { %674 = vperm.xlu0 %3217, %v545_v21   ;;  %3136 = vmatpush3.bf16.msra.mxu0 %v3133_v29  ;;  %v258_v36 = vld [vmem:[%s4285_s9 + $0x8] sm:$0xff]  ;;  %v259_v37 = vld [vmem:[%s4285_s9 + $0x10] sm:$0xff]  ;;  %v260_v38 = vld [vmem:[%s4285_s9 + $0x18] sm:$0xff] }
  0x1f   :  { %3138 = vmatprep.subr.bf16.mxu0 %v3137_v31  ;;  %v85_v40 = vld [vmem:[%s4286_s2 + $0x8] sm:$0xff]  ;;  %v84_v41 = vld [vmem:[%s4286_s2] sm:$0xff]  ;;  %v87_v47 = vld [vmem:[%s4286_s2 + $0x18] sm:$0xff] }
  0x20   :  { %2904 = vmatmul.mubr.msk.f32.gmra.mrb[4].mxu0 %vm104_vm0, %v97_v14  ;;  %v86_v48 = vld [vmem:[%s4286_s2 + $0x10] sm:$0xff]  ;;  %v89_v55 = vld [vmem:[%s4286_s2 + $0x28] sm:$0xff]  ;;  %v88_v56 = vld [vmem:[%s4286_s2 + $0x20] sm:$0xff] }
  0x21   :  { %2906 = vmatprep.mubr.msk.f32.mxu0 %vm104_vm0, %v98_v15  ;;  %686 = vperm.xlu1 %3218, %v548_v23   ;;  %v91_v63 = vld [vmem:[%s4286_s2 + $0x38] sm:$0xff]  ;;  %v90_v1 = vld [vmem:[%s4286_s2 + $0x30] sm:$0xff]  ;;  %v261_v9 = vld [vmem:[%s4285_s9 + $0x20] sm:$0xff] }
  0x22   :  { %678 = vperm.xlu0 %3217, %v546_v24   ;;  %3140 = vmatpush3.bf16.msra.mxu0 %v3137_v31  ;;  %v262_v10 = vld [vmem:[%s4285_s9 + $0x28] sm:$0xff]  ;;  %v263_v11 = vld [vmem:[%s4285_s9 + $0x30] sm:$0xff]  ;;  %v264_v12 = vld [vmem:[%s4285_s9 + $0x38] sm:$0xff] }
  0x23   :  { %v833_v13 = vld [vmem:[%s4250_s16] sm:$0xff]  ;;  %v834_v14 = vld [vmem:[%s4250_s16 + $0x8] sm:$0xff] }
  0x24   :  { %2907 = vmatmul.mubr.msk.f32.gmra.mrb[6].mxu0 %vm104_vm0, %v99_v16  ;;  %v3141_v15 = vpack.c.bf16 %v834_v14, %v833_v13  ;;  %v835_v16 = vld [vmem:[%s4250_s16 + $0x10] sm:$0xff]  ;;  %s3307_s16 = smov 96  }
  0x25   :  { %2937 = vmatprep.mubr.msk.f32.mxu0 %vm104_vm0, %v257_v30  ;;  %694 = vperm.xlu1 %3218, %v550_v32   ;;  %v3145_v18 = vpack.c.bf16 %v836_v17, %v835_v16 }
  0x26   :  { %690 = vperm.xlu0 %3217, %v549_v33   ;;  %3142 = vmatprep.subr.bf16.mxu1 %v3141_v15 }
  0x28   :  { %2938 = vmatmul.mubr.msk.f32.vlgmr.msra.gmra.mrb[8].mxu0 %vm104_vm0, %v258_v36 }
  0x29   :  { %702 = vperm.xlu1 %3218, %v552_v34   ;;  %2940 = vmatprep.mubr.msk.f32.mxu0 %vm104_vm0, %v259_v37 }
  0x2a   :  { %698 = vperm.xlu0 %3217, %v551_v35  }
  0x2c   :  { %2941 = vmatmul.mubr.msk.f32.gmra.mrb[10].mxu0 %vm104_vm0, %v260_v38 }
  0x2d   :  { %3220 = vset.pattern.permute.xlu1 %v3306_v39  ;;  %2943 = vmatprep.mubr.msk.f32.mxu0 %vm104_vm0, %v261_v9  ;;  %v3738_v9 = vld [vmem:[%s4287_s30 + $0x38] sm:$0xff] }
  0x2e   :  { %3219 = vset.pattern.permute.xlu0 %v3306_v39  ;;  %568 = vperm.xlu1 %3220, %v546_v24  }
  0x2f   :  { %563 = vperm.xlu0 %3219, %v545_v21   ;;  %v2657_v21 = vld [vmem:[%s4245_s11] ss:$0 sm:$0xff] }
  0x30   :  { %2944 = vmatmul.mubr.msk.f32.gmra.mrb[12].mxu0 %vm104_vm0, %v262_v10 }
  0x31   :  { %2946 = vmatprep.mubr.msk.f32.mxu0 %vm104_vm0, %v263_v11 }
  0x32   :  { %573 = vperm.xlu1 %3220, %v547_v20  }
  0x33   :  { %578 = vperm.xlu0 %3219, %v548_v23  }
  0x34   :  { %2947 = vmatmul.mubr.msk.f32.gmra.mrb[14].mxu0 %vm104_vm0, %v264_v12 }
  0x36   :  { %583 = vperm.xlu1 %3220, %v549_v33  }
  0x37   :  { %588 = vperm.xlu0 %3219, %v550_v32  }
  0x3a   :  { %593 = vperm.xlu1 %3220, %v551_v35  }
  0x3b   :  { %598 = vperm.xlu0 %3219, %v552_v34  }
  0x3e   :  { %3221 = vset.pattern.permute.xlu1 %v3305_v22 }
  0x3f   :  { %3222 = vset.pattern.permute.xlu0 %v3305_v22 }
  0x9c   :  { %v683_v19 = vpop.permute.xlu1 %682 }
  0x9d   :  { %v675_v20 = vpop.permute.xlu0 %674 }
  0xa0   :  { %v687_v23 = vpop.permute.xlu1 %686 }
  0xa1   :  { %v679_v25 = vpop.permute.xlu0 %678 }
  0xa4   :  { %v695_v35 = vpop.permute.xlu1 %694 }
  0xa5   :  { %v691_v36 = vpop.permute.xlu0 %690 }
  0xeb   :  { %v2899_v42 = vpop.f32.mrb[0].mxu0 }
  0xec   :  { %v235_v43 = vadd.f32 %v2899_v42, %v85_v40  ;;  %v195_v45 = vpop.f32.mrb[1].mxu0 }
  0xed   :  { %v234_v46 = vadd.f32 %v195_v45, %v84_v41 }
  0xee   :  { %v250_v51 = vadd.f32 %v2656_v44, %v235_v43 }
  0xef   :  { %v2902_v49 = vpop.f32.mrb[2].mxu0  ;;  %v249_v50 = vadd.f32 %v2656_v44, %v234_v46 }
  0xf0   :  { %v237_v52 = vadd.f32 %v2902_v49, %v87_v47  ;;  %v205_v53 = vpop.f32.mrb[3].mxu0 }
  0xf1   :  { %v236_v54 = vadd.f32 %v205_v53, %v86_v48  ;;  %2917 = vmatprep.mubr.msk.f32.mxu1 %vm104_vm0, %v249_v50  ;;  %v699_v53 = vpop.permute.xlu0 %698 }
  0xf2   :  { %2918 = vmatmul.mubr.msk.f32.vlgmr.msra.gmra.mrb[0].mxu1 %vm104_vm0, %v250_v51  ;;  %v252_v59 = vadd.f32 %v2656_v44, %v237_v52  ;;  %v703_v51 = vpop.permute.xlu1 %702 }
  0xf3   :  { %v251_v57 = vadd.f32 %v2656_v44, %v236_v54  ;;  %v2905_v58 = vpop.f32.mrb[4].mxu0  ;;  %3144 = vmatpush3.bf16.msra.mxu1 %v3141_v15 }
  0xf4   :  { %v239_v60 = vadd.f32 %v2905_v58, %v89_v55  ;;  %v215_v61 = vpop.f32.mrb[5].mxu0  ;;  %3146 = vmatprep.subr.bf16.mxu1 %v3145_v18  ;;  %v555_v58 = vld [vmem:[%s4288_s12 + $0x10] sm:$0xff] }
  0xf5   :  { %v238_v62 = vadd.f32 %v215_v61, %v88_v56  ;;  %2920 = vmatprep.mubr.msk.f32.mxu1 %vm104_vm0, %v251_v57  ;;  %v3667_v56 = vld [vmem:[%s4287_s30] sm:$0xff]  ;;  %v556_v61 = vld [vmem:[%s4288_s12 + $0x18] sm:$0xff]  ;;  %v564_v11 = vpop.permute.xlu0 %563 }
  0xf6   :  { %v254_v0 = vadd.f32 %v2656_v44, %v239_v60  ;;  %2921 = vmatmul.mubr.msk.f32.gmra.mrb[2].mxu1 %vm104_vm0, %v252_v59  ;;  %v553_v57 = vld [vmem:[%s4288_s12] sm:$0xff]  ;;  %v554_v59 = vld [vmem:[%s4288_s12 + $0x8] sm:$0xff]  ;;  %v569_v10 = vpop.permute.xlu1 %568 }
  0xf7   :  { %v253_v2 = vadd.f32 %v2656_v44, %v238_v62  ;;  %v2908_v3 = vpop.f32.mrb[6].mxu0  ;;  %3148 = vmatpush3.bf16.msra.mxu1 %v3145_v18  ;;  %v3687_v62 = vld [vmem:[%s4287_s30 + $0x8] sm:$0xff] }
  0xf8   :  { %v241_v4 = vadd.f32 %v2908_v3, %v91_v63  ;;  %v225_v5 = vpop.f32.mrb[7].mxu0  ;;  %v557_v63 = vld [vmem:[%s4288_s12 + $0x20] sm:$0xff]  ;;  %v3707_v3 = vld [vmem:[%s4287_s30 + $0x18] sm:$0xff] }
  0xf9   :  { %v240_v6 = vadd.f32 %v225_v5, %v90_v1  ;;  %2923 = vmatprep.mubr.msk.f32.mxu1 %vm104_vm0, %v253_v2  ;;  %v558_v2 = vld [vmem:[%s4288_s12 + $0x28] sm:$0xff]  ;;  %v3716_v5 = vld [vmem:[%s4287_s30 + $0x20] sm:$0xff]  ;;  %v579_v13 = vpop.permute.xlu0 %578 }
  0xfa   :  { %v256_v7 = vadd.f32 %v2656_v44, %v241_v4  ;;  %2924 = vmatmul.mubr.msk.f32.gmra.mrb[4].mxu1 %vm104_vm0, %v254_v0  ;;  %v3696_v0 = vld [vmem:[%s4287_s30 + $0x10] sm:$0xff]  ;;  %v574_v12 = vpop.permute.xlu1 %573 }
  0xfb   :  { %v255_v8 = vadd.f32 %v2656_v44, %v240_v6  ;;  %v3642_v41 = vpop.f32.mrb[8].mxu0  ;;  %v559_v4 = vld [vmem:[%s4288_s12 + $0x30] sm:$0xff]  ;;  %v560_v6 = vld [vmem:[%s4288_s12 + $0x38] sm:$0xff] }
  0xfc   :  { %v3647_v44 = vpop.f32.mrb[9].mxu0 }
  0xfd   :  { %2926 = vmatprep.mubr.msk.f32.mxu1 %vm104_vm0, %v255_v8  ;;  %v3731_v8 = vld [vmem:[%s4287_s30 + $0x30] sm:$0xff]  ;;  %v589_v14 = vpop.permute.xlu0 %588 }
  0xfe   :  { %2927 = vmatmul.mubr.msk.f32.gmra.mrb[6].mxu1 %vm104_vm0, %v256_v7  ;;  %v3725_v7 = vld [vmem:[%s4287_s30 + $0x28] sm:$0xff]  ;;  %v584_v15 = vpop.permute.xlu1 %583  ;;  %s4289_s30 = sld [smem:[#allocation12_spill]] }
  0xff   :  { %v3679_v60 = vpop.f32.mrb[10].mxu0 }
 0x100   :  { %v3698_v1 = vpop.f32.mrb[11].mxu0 }
 0x101   :  { %v599_v16 = vpop.permute.xlu0 %598 }
 0x102   :  { %v594_v17 = vpop.permute.xlu1 %593 }
 0x1c5   :  { %v2919_v24 = vpop.f32.mrb[0].mxu1 }
 0x1c6   :  { %v3628_v26 = vadd.f32 %v2919_v24, %v2657_v21  ;;  %v366_v27 = vpop.f32.mrb[1].mxu1 }
 0x1c7   :  { %v3630_v28 = vadd.f32 %v2657_v21, %v366_v27 }
 0x1c8   :  { %v706_v29 = vmul.f32 %v679_v25, %v3628_v26 }
 0x1c9   :  { %v705_v30 = vmul.f32 %v675_v20, %v3630_v28  ;;  %v2922_v31 = vpop.f32.mrb[2].mxu1  ;;  %v601_v18 = vmul.f32 %v564_v11, %v3630_v28  ;;  %v602_v20 = vmul.f32 %v569_v10, %v3628_v26  ;;  %v968_v10 = vld [vmem:[%s4251_s17 + $0x10] sm:$0xff]  ;;  %v969_v11 = vld [vmem:[%s4251_s17 + $0x18] sm:$0xff] }
 0x1ca   :  { %v3634_v32 = vadd.f32 %v2922_v31, %v2657_v21  ;;  %723 = vrot.lane.b32.xlu0 %v706_v29, %s3307_s16  ;;  %v376_v33 = vpop.f32.mrb[3].mxu1 }
 0x1cb   :  { %v3637_v34 = vadd.f32 %v2657_v21, %v376_v33  ;;  %721 = vrot.lane.b32.xlu1 %v705_v30, %s3307_s16 }
 0x1cc   :  { %v708_v37 = vmul.f32 %v687_v23, %v3634_v32  ;;  %v604_v29 = vmul.f32 %v579_v13, %v3634_v32 }
 0x1cd   :  { %v707_v38 = vmul.f32 %v683_v19, %v3637_v34  ;;  %v2925_v40 = vpop.f32.mrb[4].mxu1  ;;  %v603_v25 = vmul.f32 %v574_v12, %v3637_v34  ;;  %v3153_v12 = vpack.c.bf16 %v969_v11, %v968_v10 }
 0x1ce   :  { %v3644_v42 = vadd.f32 %v2925_v40, %v2657_v21  ;;  %727 = vrot.lane.b32.xlu0 %v708_v37, %s3307_s16  ;;  %v386_v43 = vpop.f32.mrb[5].mxu1 }
 0x1cf   :  { %v3649_v45 = vadd.f32 %v2657_v21, %v386_v43  ;;  %725 = vrot.lane.b32.xlu1 %v707_v38, %s3307_s16 }
 0x1d0   :  { %v710_v46 = vmul.f32 %v695_v35, %v3644_v42  ;;  %v606_v34 = vmul.f32 %v589_v14, %v3644_v42 }
 0x1d1   :  { %v709_v47 = vmul.f32 %v691_v36, %v3649_v45  ;;  %v2928_v48 = vpop.f32.mrb[6].mxu1  ;;  %v605_v26 = vmul.f32 %v584_v15, %v3649_v45 }
 0x1d2   :  { %v3654_v49 = vadd.f32 %v2928_v48, %v2657_v21  ;;  %731 = vrot.lane.b32.xlu0 %v710_v46, %s3307_s16  ;;  %v396_v50 = vpop.f32.mrb[7].mxu1  ;;  %v2666_v46 = vld [vmem:[%s4247_s13] ss:$0 sm:$0xff] }
 0x1d3   :  { %v3657_v52 = vadd.f32 %v2657_v21, %v396_v50  ;;  %729 = vrot.lane.b32.xlu1 %v709_v47, %s3307_s16  ;;  %v507_v47 = vadd.f32 %v2666_v46, %v3647_v44 }
 0x1d4   :  { %v712_v54 = vmul.f32 %v703_v51, %v3654_v49  ;;  %v608_v40 = vmul.f32 %v599_v16, %v3654_v49  ;;  %v512_v51 = vadd.f32 %v3642_v41, %v2666_v46  ;;  %v517_v41 = vadd.f32 %v2666_v46, %v3698_v1 }
 0x1d5   :  { %v711_v55 = vmul.f32 %v699_v53, %v3657_v52  ;;  %v607_v37 = vmul.f32 %v594_v17, %v3657_v52  ;;  %v3788_v53 = vadd.f32 %v3679_v60, %v2666_v46  ;;  %v966_v60 = vld [vmem:[%s4251_s17] sm:$0xff]  ;;  %v2945_v17 = vpop.f32.mrb[12].mxu0 }
 0x1d6   :  { %735 = vrot.lane.b32.xlu0 %v712_v54, %s3307_s16 }
 0x1d7   :  { %733 = vrot.lane.b32.xlu1 %v711_v55, %s3307_s16 }
 0x1da   :  { %1188 = vperm.xlu0 %3222, %v3667_v56  }
 0x1db   :  { %754 = vperm.xlu1 %3221, %v553_v57  }
 0x1de   :  { %762 = vperm.xlu0 %3222, %v555_v58  }
 0x1df   :  { %758 = vperm.xlu1 %3221, %v554_v59  }
 0x1e2   :  { %766 = vperm.xlu0 %3222, %v556_v61  }
 0x1e3   :  { %1192 = vperm.xlu1 %3221, %v3687_v62  }
 0x1e6   :  { %770 = vperm.xlu0 %3222, %v557_v63  }
 0x1e7   :  { %1196 = vperm.xlu1 %3221, %v3696_v0  }
 0x1ea   :  { %774 = vperm.xlu0 %3222, %v558_v2  }
 0x1eb   :  { %1200 = vperm.xlu1 %3221, %v3707_v3  }
 0x1ee   :  { %778 = vperm.xlu0 %3222, %v559_v4  }
 0x1ef   :  { %1204 = vperm.xlu1 %3221, %v3716_v5  }
 0x1f2   :  { %782 = vperm.xlu0 %3222, %v560_v6  }
 0x1f3   :  { %1208 = vperm.xlu1 %3221, %v3725_v7  }
 0x1f6   :  { %3223 = vset.pattern.permute.xlu0 %v3306_v39 }
 0x1f7   :  { %1212 = vperm.xlu1 %3221, %v3731_v8   ;;  %619 = vperm.xlu0 %3223, %v553_v57  }
 0x1fb   :  { %1216 = vperm.xlu1 %3221, %v3738_v9   ;;  %1127 = vperm.xlu0 %3223, %v3696_v0  }
 0x1ff   :  { %3224 = vset.pattern.permute.xlu1 %v3306_v39  ;;  %1137 = vperm.xlu0 %3223, %v3716_v5  }
 0x200   :  { %1117 = vperm.xlu1 %3224, %v3667_v56  }
 0x204   :  { %624 = vperm.xlu1 %3224, %v554_v59  }
 0x208   :  { %1122 = vperm.xlu1 %3224, %v3687_v62  }
 0x20c   :  { %629 = vperm.xlu1 %3224, %v555_v58  }
 0x210   :  { %634 = vperm.xlu1 %3224, %v556_v61  }
 0x214   :  { %1132 = vperm.xlu1 %3224, %v3707_v3  }
 0x218   :  { %639 = vperm.xlu1 %3224, %v557_v63   ;;  %v967_v63 = vld [vmem:[%s4251_s17 + $0x8] sm:$0xff] }
 0x21c   :  { %644 = vperm.xlu1 %3224, %v558_v2   ;;  %v3149_v2 = vpack.c.bf16 %v967_v63, %v966_v60 }
 0x21e   :  { %3150 = vmatprep.subr.bf16.mxu0 %v3149_v2 }
 0x21f   :  { %3152 = vmatpush3.bf16.msra.mxu0 %v3149_v2 }
 0x220   :  { %649 = vperm.xlu1 %3224, %v559_v4   ;;  %3154 = vmatprep.subr.bf16.mxu0 %v3153_v12 }
 0x223   :  { %3156 = vmatpush3.bf16.msra.mxu0 %v3153_v12 }
 0x224   :  { %654 = vperm.xlu1 %3224, %v560_v6  }
 0x228   :  { %1152 = vperm.xlu1 %3224, %v3738_v9  }
 0x23c   :  { %v724_v19 = vpop.permute.xlu0 %723 }
 0x23d   :  { %v722_v21 = vpop.permute.xlu1 %721  ;;  %v746_v24 = vadd.f32 %v724_v19, %v602_v20  ;;  %v526_v19 = vpop.f32.mrb[13].mxu0 }
 0x23e   :  { %v3750_v23 = vadd.f32 %v722_v21, %v601_v18  ;;  %v532_v18 = vadd.f32 %v2945_v17, %v2666_v46  ;;  %v527_v20 = vadd.f32 %v2666_v46, %v526_v19  ;;  %v2948_v21 = vpop.f32.mrb[14].mxu0 }
 0x240   :  { %v728_v27 = vpop.permute.xlu0 %727  ;;  %2957 = vmatprep.mubr.msk.f32.mxu1 %vm104_vm0, %v3750_v23 }
 0x241   :  { %v726_v30 = vpop.permute.xlu1 %725  ;;  %2958 = vmatmul.mubr.msk.f32.vlgmr.msra.gmra.mrb[8].mxu1 %vm104_vm0, %v746_v24  ;;  %v3759_v28 = vadd.f32 %v728_v27, %v604_v29  ;;  %v536_v27 = vpop.f32.mrb[15].mxu0 }
 0x242   :  { %v3757_v31 = vadd.f32 %v726_v30, %v603_v25  ;;  %v542_v25 = vadd.f32 %v2948_v21, %v2666_v46 }
 0x244   :  { %v732_v33 = vpop.permute.xlu0 %731  ;;  %2960 = vmatprep.mubr.msk.f32.mxu1 %vm104_vm0, %v3757_v31 }
 0x245   :  { %v730_v35 = vpop.permute.xlu1 %729  ;;  %2961 = vmatmul.mubr.msk.f32.gmra.mrb[10].mxu1 %vm104_vm0, %v3759_v28  ;;  %v3769_v36 = vadd.f32 %v732_v33, %v606_v34 }
 0x246   :  { %v3767_v32 = vadd.f32 %v730_v35, %v605_v26 }
 0x248   :  { %v736_v38 = vpop.permute.xlu0 %735  ;;  %2963 = vmatprep.mubr.msk.f32.mxu1 %vm104_vm0, %v3767_v32 }
 0x249   :  { %v734_v43 = vpop.permute.xlu1 %733  ;;  %2964 = vmatmul.mubr.msk.f32.gmra.mrb[12].mxu1 %vm104_vm0, %v3769_v36  ;;  %v752_v45 = vadd.f32 %v736_v38, %v608_v40 }
 0x24a   :  { %v751_v42 = vadd.f32 %v734_v43, %v607_v37 }
 0x24c   :  { %2966 = vmatprep.mubr.msk.f32.mxu1 %vm104_vm0, %v751_v42 }
 0x24d   :  { %2967 = vmatmul.mubr.msk.f32.gmra.mrb[14].mxu1 %vm104_vm0, %v752_v45 }
 0x24e   :  { %2991 = vmatprep.mubr.msk.f32.mxu1 %vm1316_vm2, %v3667_v56 }
 0x259   :  { %v3783_v48 = vpop.permute.xlu0 %1188 }
 0x25a   :  { %v755_v50 = vpop.permute.xlu1 %754 }
 0x25b   :  { %v785_v49 = vmul.f32 %v755_v50, %v507_v47 }
 0x25d   :  { %v763_v52 = vpop.permute.xlu0 %762  ;;  %801 = vrot.lane.b32.xlu0 %v785_v49, %s3307_s16 }
 0x25e   :  { %v759_v54 = vpop.permute.xlu1 %758  ;;  %v787_v4 = vmul.f32 %v763_v52, %v517_v41 }
 0x25f   :  { %v786_v57 = vmul.f32 %v759_v54, %v512_v51 }
 0x261   :  { %v767_v55 = vpop.permute.xlu0 %766  ;;  %1142 = vperm.xlu0 %3223, %v3725_v7  }
 0x262   :  { %v788_v58 = vmul.f32 %v767_v55, %v3788_v53  ;;  %v3792_v44 = vpop.permute.xlu1 %1192 }
 0x264   :  { %807 = vrot.lane.b32.xlu1 %v788_v58, %s3307_s16 }
 0x265   :  { %803 = vrot.lane.b32.xlu0 %v786_v57, %s3307_s16  ;;  %v771_v59 = vpop.permute.xlu0 %770  ;;  %v1450_v57 = vld [vmem:[%s4253_s19] sm:$0xff] }
 0x266   :  { %v3797_v61 = vpop.permute.xlu1 %1196  ;;  %v3830_v26 = vmul.f32 %v771_v59, %v527_v20 }
 0x268   :  { %972 = vrot.lane.b32.xlu1 %v746_v24, %s3308_s6 }
 0x269   :  { %1147 = vperm.xlu0 %3223, %v3731_v8   ;;  %v775_v6 = vpop.permute.xlu0 %774 }
 0x26a   :  { %v3807_v1 = vpop.permute.xlu1 %1200  ;;  %v3826_v24 = vmul.f32 %v775_v6, %v532_v18 }
 0x26c   :  { %984 = vrot.lane.b32.xlu1 %v752_v45, %s3308_s6 }
 0x26d   :  { %805 = vrot.lane.b32.xlu0 %v787_v4, %s3307_s16  ;;  %v779_v13 = vpop.permute.xlu0 %778 }
 0x26e   :  { %v3817_v14 = vpop.permute.xlu1 %1204 }
 0x270   :  { %982 = vrot.lane.b32.xlu1 %v751_v42, %s3308_s6 }
 0x271   :  { %970 = vrot.lane.b32.xlu0 %v3750_v23, %s3308_s6  ;;  %v783_v15 = vpop.permute.xlu0 %782  ;;  %v537_v23 = vadd.f32 %v2666_v46, %v536_v27 }
 0x272   :  { %v3822_v16 = vpop.permute.xlu1 %1208  ;;  %v3832_v34 = vmul.f32 %v783_v15, %v542_v25 }
 0x273   :  { %v3834_v35 = vmul.f32 %v779_v13, %v537_v23 }
 0x275   :  { %976 = vrot.lane.b32.xlu0 %v3759_v28, %s3308_s6 }
 0x276   :  { %v3828_v29 = vpop.permute.xlu1 %1212  ;;  %v620_v30 = vpop.permute.xlu0 %619 }
 0x277   :  { %v657_v33 = vmul.f32 %v620_v30, %v507_v47 }
 0x279   :  { %974 = vrot.lane.b32.xlu0 %v3757_v31, %s3308_s6 }
 0x27a   :  { %v3838_v37 = vpop.permute.xlu1 %1216 }
 0x27d   :  { %980 = vrot.lane.b32.xlu0 %v3769_v36, %s3308_s6 }
 0x27f   :  { %v3842_v28 = vpop.permute.xlu1 %1117 }
 0x281   :  { %978 = vrot.lane.b32.xlu0 %v3767_v32, %s3308_s6 }
 0x283   :  { %v625_v38 = vpop.permute.xlu1 %624 }
 0x284   :  { %v658_v40 = vmul.f32 %v625_v38, %v512_v51  ;;  %v1453_v38 = vld [vmem:[%s4253_s19 + $0x18] sm:$0xff] }
 0x287   :  { %v3846_v43 = vpop.permute.xlu1 %1122 }
 0x28b   :  { %v630_v42 = vpop.permute.xlu1 %629 }
 0x28c   :  { %v659_v45 = vmul.f32 %v630_v42, %v517_v41  ;;  %v3865_v41 = vpop.permute.xlu0 %1127  ;;  %v1315_v42 = vld [vmem:[%s4252_s18] sm:$0x3] }
 0x28d   :  { %2989 = vmatprep.subr.msk.mxu1 %vm1333_vm1, %v1315_v42 }
 0x28e   :  { %2990 = vmatpush3.msk.msra.mxu1 %vm1333_vm1, %v1315_v42 }
 0x28f   :  { %v635_v46 = vpop.permute.xlu1 %634  ;;  %2992 = vmatmul.mubr.msk.f32.vlgmr.msra.gmra.mrb[16].mxu1 %vm1316_vm2, %v3687_v62 }
 0x290   :  { %v660_v47 = vmul.f32 %v635_v46, %v3788_v53  ;;  %v1451_v53 = vld [vmem:[%s4253_s19 + $0x8] sm:$0xff]  ;;  %v3867_v59 = vpop.permute.xlu0 %1137  ;;  %2994 = vmatprep.mubr.msk.f32.mxu1 %vm1316_vm2, %v3696_v0 }
 0x291   :  { %v3157_v58 = vpack.c.bf16 %v1451_v53, %v1450_v57  ;;  %v1620_v57 = vld [vmem:[%s4289_s30 + $0x20] sm:$0xff]  ;;  %v1619_v53 = vld [vmem:[%s4289_s30 + $0x18] sm:$0xff] }
 0x293   :  { %v3849_v31 = vpop.permute.xlu1 %1132  ;;  %3158 = vmatprep.subr.bf16.mxu0 %v3157_v58  ;;  %2995 = vmatmul.mubr.msk.f32.gmra.mrb[18].mxu1 %vm1316_vm2, %v3707_v3 }
 0x294   :  { %2997 = vmatprep.mubr.msk.f32.mxu1 %vm1316_vm2, %v3716_v5 }
 0x297   :  { %v640_v50 = vpop.permute.xlu1 %639  ;;  %2998 = vmatmul.mubr.msk.f32.gmra.mrb[20].mxu1 %vm1316_vm2, %v3725_v7 }
 0x298   :  { %v3851_v52 = vmul.f32 %v640_v50, %v527_v20  ;;  %3000 = vmatprep.mubr.msk.f32.mxu1 %vm1316_vm2, %v3731_v8 }
 0x29b   :  { %v645_v49 = vpop.permute.xlu1 %644  ;;  %3001 = vmatmul.mubr.msk.f32.gmra.mrb[22].mxu1 %vm1316_vm2, %v3738_v9 }
 0x29c   :  { %v3853_v36 = vmul.f32 %v645_v49, %v532_v18 }
 0x29f   :  { %v650_v54 = vpop.permute.xlu1 %649 }
 0x2a0   :  { %v3855_v32 = vmul.f32 %v650_v54, %v537_v23 }
 0x2a3   :  { %v655_v55 = vpop.permute.xlu1 %654 }
 0x2a4   :  { %v3857_v51 = vmul.f32 %v655_v55, %v542_v25 }
 0x2a7   :  { %v3869_v63 = vpop.permute.xlu1 %1152 }
 0x2cf   :  { %v802_v60 = vpop.permute.xlu0 %801 }
 0x2d0   :  { %v3871_v2 = vadd.f32 %v802_v60, %v657_v33  ;;  %v1452_v33 = vld [vmem:[%s4253_s19 + $0x10] sm:$0xff]  ;;  %v1621_v60 = vld [vmem:[%s4289_s30 + $0x28] sm:$0xff] }
 0x2d6   :  { %v808_v4 = vpop.permute.xlu1 %807 }
 0x2d7   :  { %v3873_v6 = vadd.f32 %v808_v4, %v660_v47  ;;  %v1623_v4 = vld [vmem:[%s4289_s30 + $0x38] sm:$0xff] }
 0x2da   :  { %v973_v19 = vpop.permute.xlu1 %972 }
 0x2de   :  { %v985_v25 = vpop.permute.xlu1 %984 }
 0x2e0   :  { %v3875_v10 = vpop.permute.xlu0 %1142 }
 0x2e2   :  { %v983_v23 = vpop.permute.xlu1 %982 }
 0x2e4   :  { %v804_v11 = vpop.permute.xlu0 %803 }
 0x2e5   :  { %v3877_v12 = vadd.f32 %v804_v11, %v658_v40  ;;  %v3161_v40 = vpack.c.bf16 %v1453_v38, %v1452_v33 }
 0x2e8   :  { %v3879_v13 = vpop.permute.xlu0 %1147 }
 0x2ec   :  { %v806_v15 = vpop.permute.xlu0 %805 }
 0x2ed   :  { %v3881_v17 = vadd.f32 %v806_v15, %v659_v45 }
 0x2f0   :  { %v971_v18 = vpop.permute.xlu0 %970 }
 0x2f1   :  { %2977 = vmatprep.mubr.msk.f32.mxu0 %vm104_vm0, %v971_v18 }
 0x2f2   :  { %2978 = vmatmul.mubr.msk.f32.vlgmr.msra.gmra.mrb[16].mxu0 %vm104_vm0, %v973_v19 }
 0x2f3   :  { %3160 = vmatpush3.bf16.msra.mxu0 %v3157_v58  ;;  %v1622_v58 = vld [vmem:[%s4289_s30 + $0x30] sm:$0xff] }
 0x2f4   :  { %v977_v20 = vpop.permute.xlu0 %976  ;;  %3162 = vmatprep.subr.bf16.mxu0 %v3161_v40 }
 0x2f7   :  { %3164 = vmatpush3.bf16.msra.mxu0 %v3161_v40 }
 0x2f8   :  { %v975_v21 = vpop.permute.xlu0 %974 }
 0x2f9   :  { %2980 = vmatprep.mubr.msk.f32.mxu0 %vm104_vm0, %v975_v21 }
 0x2fa   :  { %2981 = vmatmul.mubr.msk.f32.gmra.mrb[18].mxu0 %vm104_vm0, %v977_v20 }
 0x2fc   :  { %v981_v27 = vpop.permute.xlu0 %980 }
 0x300   :  { %v979_v30 = vpop.permute.xlu0 %978 }
 0x301   :  { %2983 = vmatprep.mubr.msk.f32.mxu0 %vm104_vm0, %v979_v30 }
 0x302   :  { %2984 = vmatmul.mubr.msk.f32.gmra.mrb[20].mxu0 %vm104_vm0, %v981_v27 }
 0x303   :  { %2986 = vmatprep.mubr.msk.f32.mxu0 %vm104_vm0, %v983_v23 }
 0x306   :  { %2987 = vmatmul.mubr.msk.f32.gmra.mrb[22].mxu0 %vm104_vm0, %v985_v25 }
 0x314   :  { %v2959_v45 = vpop.f32.mrb[8].mxu1 }
 0x315   :  { %v1220_v46 = vmul.f32 %v2959_v45, %v3792_v44  ;;  %v927_v47 = vpop.f32.mrb[9].mxu1  ;;  %v1156_v11 = vmul.f32 %v2959_v45, %v3846_v43 }
 0x316   :  { %v1219_v50 = vmul.f32 %v3783_v48, %v927_v47  ;;  %v1155_v15 = vmul.f32 %v3842_v28, %v927_v47 }
 0x317   :  { %1237 = vrot.lane.b32.xlu0 %v1220_v46, %s3307_s16 }
 0x318   :  { %1235 = vrot.lane.b32.xlu1 %v1219_v50, %s3307_s16  ;;  %v2962_v56 = vpop.f32.mrb[10].mxu1 }
 0x319   :  { %v1222_v62 = vmul.f32 %v2962_v56, %v3807_v1  ;;  %v937_v0 = vpop.f32.mrb[11].mxu1  ;;  %v1158_v25 = vmul.f32 %v2962_v56, %v3849_v31 }
 0x31a   :  { %v1221_v5 = vmul.f32 %v3797_v61, %v937_v0 }
 0x31b   :  { %1241 = vrot.lane.b32.xlu0 %v1222_v62, %s3307_s16 }
 0x31c   :  { %809 = vrot.lane.b32.xlu1 %v3830_v26, %s3307_s16  ;;  %v2965_v3 = vpop.f32.mrb[12].mxu1 }
 0x31d   :  { %v947_v49 = vpop.f32.mrb[13].mxu1  ;;  %v1224_v8 = vmul.f32 %v2965_v3, %v3822_v16  ;;  %v1160_v47 = vmul.f32 %v2965_v3, %v3875_v10 }
 0x31e   :  { %v1223_v9 = vmul.f32 %v3817_v14, %v947_v49  ;;  %v1159_v62 = vmul.f32 %v3867_v59, %v947_v49 }
 0x31f   :  { %1239 = vrot.lane.b32.xlu0 %v1221_v5, %s3307_s16 }
 0x320   :  { %811 = vrot.lane.b32.xlu1 %v3826_v24, %s3307_s16  ;;  %v3930_v7 = vpop.f32.mrb[14].mxu1  ;;  %v1616_v24 = vld [vmem:[%s4289_s30] sm:$0xff] }
 0x321   :  { %v957_v54 = vpop.f32.mrb[15].mxu1  ;;  %v1226_v55 = vmul.f32 %v3930_v7, %v3838_v37  ;;  %v1162_v49 = vmul.f32 %v3930_v7, %v3869_v63 }
 0x322   :  { %v1225_v26 = vmul.f32 %v3828_v29, %v957_v54  ;;  %v1161_v3 = vmul.f32 %v3879_v13, %v957_v54 }
 0x323   :  { %1245 = vrot.lane.b32.xlu0 %v1224_v8, %s3307_s16 }
 0x324   :  { %813 = vrot.lane.b32.xlu1 %v3834_v35, %s3307_s16  ;;  %v1618_v35 = vld [vmem:[%s4289_s30 + $0x10] sm:$0xff] }
 0x327   :  { %1243 = vrot.lane.b32.xlu0 %v1223_v9, %s3307_s16 }
 0x328   :  { %815 = vrot.lane.b32.xlu1 %v3832_v34, %s3307_s16  ;;  %v1617_v34 = vld [vmem:[%s4289_s30 + $0x8] sm:$0xff]  ;;  %s4291_s30 = sld [smem:[#allocation14_spill]] }
 0x32b   :  { %1247 = vrot.lane.b32.xlu0 %v1225_v26, %s3307_s16 }
 0x32c   :  { %1625 = vperm.xlu1 %3224, %v1616_v24  }
 0x32f   :  { %1249 = vrot.lane.b32.xlu0 %v1226_v55, %s3307_s16 }
 0x330   :  { %1631 = vperm.xlu1 %3224, %v1618_v35  }
 0x333   :  { %1628 = vperm.xlu0 %3223, %v1617_v34  }
 0x334   :  { %1637 = vperm.xlu1 %3224, %v1620_v57  }
 0x337   :  { %1634 = vperm.xlu0 %3223, %v1619_v53  }
 0x338   :  { %1643 = vperm.xlu1 %3224, %v1622_v58  }
 0x33b   :  { %1640 = vperm.xlu0 %3223, %v1621_v60  }
 0x33c   :  { %3225 = vset.pattern.permute.xlu1 %v3305_v22 }
 0x33f   :  { %1646 = vperm.xlu0 %3223, %v1623_v4  }
 0x343   :  { %3226 = vset.pattern.permute.xlu0 %v3305_v22  ;;  %v1157_v22 = vmul.f32 %v3865_v41, %v937_v0 }
 0x389   :  { %v1238_v18 = vpop.permute.xlu0 %1237 }
 0x38a   :  { %v1260_v19 = vadd.f32 %v1238_v18, %v1156_v11  ;;  %v1236_v20 = vpop.permute.xlu1 %1235 }
 0x38b   :  { %v1259_v21 = vadd.f32 %v1236_v20, %v1155_v15 }
 0x38c   :  { %v1443_v27 = vmul.f32 %v1260_v19, %v3877_v12 }
 0x38d   :  { %v1442_v30 = vmul.f32 %v1259_v21, %v3871_v2  ;;  %v1242_v23 = vpop.permute.xlu0 %1241 }
 0x38e   :  { %v1262_v33 = vadd.f32 %v1242_v23, %v1158_v25  ;;  %v810_v38 = vpop.permute.xlu1 %809 }
 0x38f   :  { %3011 = vmatprep.mubr.msk.f32.mxu0 %vm104_vm0, %v1442_v30  ;;  %v829_v8 = vadd.f32 %v810_v38, %v3851_v52  ;;  %v1600_v38 = vlaneseq }
 0x390   :  { %v1445_v40 = vmul.f32 %v1262_v33, %v3873_v6  ;;  %3012 = vmatmul.mubr.msk.f32.vlgmr.msra.gmra.mrb[24].mxu0 %vm104_vm0, %v1443_v27 }
 0x391   :  { %v1240_v42 = vpop.permute.xlu0 %1239 }
 0x392   :  { %v1261_v45 = vadd.f32 %v1240_v42, %v1157_v22  ;;  %v812_v46 = vpop.permute.xlu1 %811  ;;  %v4040_v22 = vld [vmem:[%s4290_s28] ss:$0 sm:$0xff] }
 0x393   :  { %v830_v2 = vadd.f32 %v812_v46, %v3853_v36 }
 0x394   :  { %v1444_v12 = vmul.f32 %v1261_v45, %v3881_v17 }
 0x395   :  { %v1246_v50 = vpop.permute.xlu0 %1245 }
 0x396   :  { %v1264_v56 = vadd.f32 %v1246_v50, %v1160_v47  ;;  %3014 = vmatprep.mubr.msk.f32.mxu0 %vm104_vm0, %v1444_v12  ;;  %v814_v0 = vpop.permute.xlu1 %813 }
 0x397   :  { %3015 = vmatmul.mubr.msk.f32.gmra.mrb[26].mxu0 %vm104_vm0, %v1445_v40  ;;  %v831_v24 = vadd.f32 %v814_v0, %v3855_v32  ;;  %v3309_v40 = vmov 0.0  }
 0x398   :  { %v1447_v6 = vmul.f32 %v1264_v56, %v830_v2 }
 0x399   :  { %v1244_v5 = vpop.permute.xlu0 %1243 }
 0x39a   :  { %v1263_v9 = vadd.f32 %v1244_v5, %v1159_v62  ;;  %v816_v55 = vpop.permute.xlu1 %815 }
 0x39b   :  { %v832_v52 = vadd.f32 %v816_v55, %v3857_v51 }
 0x39c   :  { %v1446_v26 = vmul.f32 %v1263_v9, %v829_v8 }
 0x39d   :  { %v1248_v17 = vpop.permute.xlu0 %1247 }
 0x39e   :  { %v1265_v36 = vadd.f32 %v1248_v17, %v1161_v3  ;;  %3017 = vmatprep.mubr.msk.f32.mxu0 %vm104_vm0, %v1446_v26 }
 0x39f   :  { %3018 = vmatmul.mubr.msk.f32.gmra.mrb[28].mxu0 %vm104_vm0, %v1447_v6 }
 0x3a0   :  { %v1448_v35 = vmul.f32 %v1265_v36, %v831_v24 }
 0x3a1   :  { %v1250_v34 = vpop.permute.xlu0 %1249 }
 0x3a2   :  { %v1266_v57 = vadd.f32 %v1250_v34, %v1162_v49  ;;  %3020 = vmatprep.mubr.msk.f32.mxu0 %vm104_vm0, %v1448_v35 }
 0x3a4   :  { %v1449_v54 = vmul.f32 %v1266_v57, %v832_v52 }
 0x3a6   :  { %3021 = vmatmul.mubr.msk.f32.gmra.mrb[30].mxu0 %vm104_vm0, %v1449_v54 }
 0x3c5   :  { %v3996_v32 = vpop.f32.mrb[16].mxu0 }
 0x3c6   :  { %v1268_v53 = vmul.f32 %v3996_v32, %v3792_v44  ;;  %v4000_v58 = vpop.f32.mrb[17].mxu0 }
 0x3c7   :  { %v1267_v7 = vmul.f32 %v3783_v48, %v4000_v58 }
 0x3c8   :  { %1285 = vrot.lane.b32.xlu0 %v1268_v53, %s3307_s16 }
 0x3c9   :  { %1283 = vrot.lane.b32.xlu1 %v1267_v7, %s3307_s16 }
 0x3cd   :  { %v4006_v51 = vpop.f32.mrb[18].mxu0 }
 0x3ce   :  { %v1270_v60 = vmul.f32 %v4006_v51, %v3807_v1  ;;  %v4010_v4 = vpop.f32.mrb[19].mxu0 }
 0x3cf   :  { %v1269_v11 = vmul.f32 %v3797_v61, %v4010_v4 }
 0x3d0   :  { %1289 = vrot.lane.b32.xlu0 %v1270_v60, %s3307_s16 }
 0x3d1   :  { %1287 = vrot.lane.b32.xlu1 %v1269_v11, %s3307_s16 }
 0x3d5   :  { %v4016_v44 = vpop.f32.mrb[20].mxu0 }
 0x3d6   :  { %v1272_v48 = vmul.f32 %v4016_v44, %v3822_v16  ;;  %v4020_v15 = vpop.f32.mrb[21].mxu0  ;;  %v2993_v16 = vpop.f32.mrb[16].mxu1 }
 0x3d7   :  { %v1271_v18 = vmul.f32 %v3817_v14, %v4020_v15  ;;  %v1403_v14 = vpop.f32.mrb[17].mxu1 }
 0x3d8   :  { %1293 = vrot.lane.b32.xlu0 %v1272_v48, %s3307_s16  ;;  %v2996_v21 = vpop.f32.mrb[18].mxu1 }
 0x3d9   :  { %v4025_v1 = vpop.f32.mrb[22].mxu0  ;;  %1291 = vrot.lane.b32.xlu1 %v1271_v18, %s3307_s16  ;;  %v1413_v25 = vpop.f32.mrb[19].mxu1 }
 0x3da   :  { %v1274_v61 = vmul.f32 %v4025_v1, %v3838_v37  ;;  %v4030_v19 = vpop.f32.mrb[23].mxu0  ;;  %v2999_v27 = vpop.f32.mrb[20].mxu1  ;;  %v1601_v37 = vshrl.u32 %v1600_v38, 7 }
 0x3db   :  { %v1273_v20 = vmul.f32 %v3828_v29, %v4030_v19  ;;  %v1423_v30 = vpop.f32.mrb[21].mxu1 }
 0x3dc   :  { %1297 = vrot.lane.b32.xlu0 %v1274_v61, %s3307_s16  ;;  %v3002_v23 = vpop.f32.mrb[22].mxu1  ;;  %v4042_v29 = vadd.s32 8, %v1601_v37  ;;  %vm1608_vm4 = vcmp.eq.s32.totalorder %v1601_v37, %v4040_v22 }
 0x3dd   :  { %1295 = vrot.lane.b32.xlu1 %v1273_v20, %s3307_s16  ;;  %v1433_v33 = vpop.f32.mrb[23].mxu1  ;;  %v4046_v42 = vsel %vm1608_vm4, 1.0, %v3309_v40  ;;  %vm1971_vm4 = vcmask 1043456  }
 0x3de   :  { %vm1609_vm5 = vcmp.eq.s32.totalorder %v4042_v29, %v4040_v22  ;;  %3039 = vmatprep.mubr.msk.f32.mxu1 %vm1718_vm3, %v4046_v42 }
 0x463   :  { %v3013_v45 = vpop.f32.mrb[24].mxu0 }
 0x464   :  { %v1584_v46 = vmul.f32 %v3013_v45, %v2993_v16  ;;  %v1544_v47 = vpop.f32.mrb[25].mxu0 }
 0x465   :  { %v1583_v12 = vmul.f32 %v1544_v47, %v1403_v14 }
 0x466   :  { %v1593_v0 = vmul.f32 0.35355338, %v1584_v46 }
 0x467   :  { %v1592_v9 = vmul.f32 0.35355338, %v1583_v12 }
 0x468   :  { %v1674_v24 = vsel %vm1672_vm6, %v1593_v0, -inf }
 0x469   :  { %v1673_v55 = vsel %vm1672_vm6, %v1592_v9, -inf }
 0x46a   :  { %v3016_v50 = vpop.f32.mrb[26].mxu0 }
 0x46b   :  { %v1586_v2 = vmul.f32 %v3016_v50, %v2996_v21  ;;  %v1554_v56 = vpop.f32.mrb[27].mxu0 }
 0x46c   :  { %v1585_v62 = vmul.f32 %v1554_v56, %v1413_v25 }
 0x46d   :  { %v1595_v57 = vmul.f32 0.35355338, %v1586_v2 }
 0x46e   :  { %v1594_v7 = vmul.f32 0.35355338, %v1585_v62 }
 0x46f   :  { %v1676_v61 = vsel %vm1672_vm6, %v1595_v57, -inf }
 0x470   :  { %v1675_v16 = vsel %vm1672_vm6, %v1594_v7, -inf }
 0x472   :  { %v3019_v6 = vpop.f32.mrb[28].mxu0 }
 0x473   :  { %v1588_v5 = vmul.f32 %v3019_v6, %v2999_v27  ;;  %v1564_v8 = vpop.f32.mrb[29].mxu0 }
 0x474   :  { %v1587_v3 = vmul.f32 %v1564_v8, %v1423_v30 }
 0x475   :  { %v1597_v26 = vmul.f32 0.35355338, %v1588_v5 }
 0x476   :  { %v1596_v17 = vmul.f32 0.35355338, %v1587_v3 }
 0x477   :  { %v1679_v36 = vsel %vm1672_vm6, %v1597_v26, -inf }
 0x478   :  { %v1680_v49 = vmax.f32 %v1674_v24, %v1679_v36  ;;  %v1677_v35 = vsel %vm1672_vm6, %v1596_v17, -inf }
 0x479   :  { %v1678_v34 = vmax.f32 %v1673_v55, %v1677_v35  ;;  %v3022_v52 = vpop.f32.mrb[30].mxu0 }
 0x47a   :  { %v1590_v54 = vmul.f32 %v3022_v52, %v3002_v23  ;;  %v1574_v53 = vpop.f32.mrb[31].mxu0 }
 0x47b   :  { %v1685_v60 = vmax.f32 %v1678_v34, %v1680_v49  ;;  %v1589_v11 = vmul.f32 %v1574_v53, %v1433_v33 }
 0x47c   :  { %v1599_v48 = vmul.f32 0.35355338, %v1590_v54 }
 0x47d   :  { %v1598_v18 = vmul.f32 0.35355338, %v1589_v11 }
 0x47e   :  { %v1683_v20 = vsel %vm1672_vm6, %v1599_v48, -inf }
 0x47f   :  { %v1684_v14 = vmax.f32 %v1676_v61, %v1683_v20  ;;  %v1681_v21 = vsel %vm1672_vm6, %v1598_v18, -inf  ;;  %v1615_v61 = vand.u32 127, %v1600_v38  ;;  %v1626_v20 = vpop.permute.xlu1 %1625  ;;  %v1629_v38 = vpop.permute.xlu0 %1628 }
 0x480   :  { %v1682_v25 = vmax.f32 %v1675_v16, %v1681_v21  ;;  %v4089_v16 = vsel %vm1609_vm5, 1.0, %v3309_v40 }
 0x481   :  { %vm1648_vm7 = vcmp.eq.s32.totalorder %v1615_v61, %v1626_v20  ;;  %vm1649_vm9 = vcmp.eq.s32.totalorder %v1615_v61, %v1629_v38  ;;  %v4141_v38 = vld [vmem:[%s4291_s30 + $0x8] sm:$0xff] }
 0x482   :  { %v1686_v27 = vmax.f32 %v1682_v25, %v1684_v14  ;;  %v2711_v14 = vsel %vm1648_vm7, 1.0, %v3309_v40  ;;  %v2712_v22 = vsel %vm1649_vm9, 1.0, %v3309_v40  ;;  %2287 = vperm.xlu0 %3226, %v4141_v38  }
 0x483   :  { %v1632_v21 = vpop.permute.xlu1 %1631 }
 0x484   :  { %v1687_v30 = vmax.f32 %v1685_v60, %v1686_v27  ;;  %v1635_v27 = vpop.permute.xlu0 %1634  ;;  %vm1650_vm10 = vcmp.eq.s32.totalorder %v1615_v61, %v1632_v21  ;;  %v1172_v21 = vmul.f32 %v3996_v32, %v3846_v43 }
 0x485   :  { %vm1651_vm11 = vcmp.eq.s32.totalorder %v1615_v61, %v1635_v27 }
 0x486   :  { %v1688_v37 = vrot.slane %v1687_v30, 4  ;;  %3228 = vset.pattern.permute.xlu0 %v3306_v39 }
 0x488   :  { %v1689_v23 = vmax.f32 %v1687_v30, %v1688_v37  ;;  %v1641_v29 = vpop.permute.xlu0 %1640 }
 0x489   :  { %vm1653_vm13 = vcmp.eq.s32.totalorder %v1615_v61, %v1641_v29  ;;  %v1174_v29 = vmul.f32 %v4006_v51, %v3849_v31  ;;  %v1175_v31 = vmul.f32 %v3867_v59, %v4020_v15 }
 0x48a   :  { %v1690_v45 = vrot.slane %v1689_v23, 2 }
 0x48c   :  { %v1691_v46 = vmax.f32 %v1689_v23, %v1690_v45  ;;  %v1638_v23 = vpop.permute.xlu1 %1637  ;;  %v2713_v45 = vsel %vm1650_vm10, 1.0, %v3309_v40 }
 0x48d   :  { %vm1652_vm12 = vcmp.eq.s32.totalorder %v1615_v61, %v1638_v23 }
 0x48e   :  { %v1692_v47 = vrot.slane %v1691_v46, 1 }
 0x490   :  { %v1693_v33 = vmax.f32 %v1691_v46, %v1692_v47  ;;  %v1644_v46 = vpop.permute.xlu1 %1643  ;;  %v2714_v47 = vsel %vm1651_vm11, 1.0, %v3309_v40 }
 0x491   :  { %vm1654_vm14 = vcmp.eq.s32.totalorder %v1615_v61, %v1644_v46  ;;  %v1173_v46 = vmul.f32 %v3865_v41, %v4010_v4 }
 0x492   :  { %v1700_v12 = vsub.f32 %v1598_v18, %v1693_v33  ;;  %v1694_v50 = vsub.f32 %v1592_v9, %v1693_v33  ;;  %v1695_v2 = vsub.f32 %v1593_v0, %v1693_v33  ;;  %v1696_v56 = vsub.f32 %v1594_v7, %v1693_v33 }
 0x493   :  { %v1697_v62 = vsub.f32 %v1595_v57, %v1693_v33  ;;  %v1698_v6 = vsub.f32 %v1596_v17, %v1693_v33  ;;  %v1699_v5 = vsub.f32 %v1597_v26, %v1693_v33  ;;  %v1701_v8 = vsub.f32 %v1599_v48, %v1693_v33 }
 0x494   :  { %v1702_v3 = vmul.f32 1.442695, %v1694_v50  ;;  %v1704_v24 = vmul.f32 1.442695, %v1695_v2  ;;  %v1706_v36 = vmul.f32 1.442695, %v1696_v56 }
 0x495   :  { %v1708_v55 = vmul.f32 1.442695, %v1697_v62  ;;  %v1710_v49 = vmul.f32 1.442695, %v1698_v6  ;;  %v1712_v35 = vmul.f32 1.442695, %v1699_v5 }
 0x496   :  { %3229 = vpow2.f32 %v1702_v3  ;;  %v1714_v34 = vmul.f32 1.442695, %v1700_v12  ;;  %v1716_v9 = vmul.f32 1.442695, %v1701_v8  ;;  %v2715_v33 = vsel %vm1652_vm12, 1.0, %v3309_v40  ;;  %v1647_v12 = vpop.permute.xlu0 %1646 }
 0x497   :  { %3231 = vpow2.f32 %v1704_v24  ;;  %v2716_v50 = vsel %vm1653_vm13, 1.0, %v3309_v40  ;;  %v2717_v2 = vsel %vm1654_vm14, 1.0, %v3309_v40  ;;  %vm1655_vm15 = vcmp.eq.s32.totalorder %v1615_v61, %v1647_v12  ;;  %v1946_v62 = vld [vmem:[%s4254_s20] sm:$0xf] }
 0x498   :  { %3233 = vpow2.f32 %v1706_v36  ;;  %v2718_v56 = vsel %vm1655_vm15, 1.0, %v3309_v40  ;;  %3058 = vmatprep.subr.msk.mxu0 %vm1971_vm4, %v1946_v62 }
 0x499   :  { %3235 = vpow2.f32 %v1708_v55  ;;  %3059 = vmatpush3.msk.msra.mxu0 %vm1971_vm4, %v1946_v62 }
 0x49a   :  { %3237 = vpow2.f32 %v1710_v49 }
 0x49b   :  { %3239 = vpow2.f32 %v1712_v35 }
 0x49c   :  { %3241 = vpow2.f32 %v1714_v34 }
 0x49d   :  { %3243 = vpow2.f32 %v1716_v9 }
 0x4a0   :  { %v4060_v0 = vpop.eup %3229 }
 0x4a1   :  { %v4062_v26 = vpop.eup %3231 }
 0x4a2   :  { %v4064_v17 = vpop.eup %3233  ;;  %v3165_v52 = vpack.c.bf16 %v4062_v26, %v4060_v0 }
 0x4a3   :  { %v4068_v57 = vpop.eup %3235 }
 0x4a4   :  { %v4070_v54 = vpop.eup %3237  ;;  %3166 = vmatprep.subr.bf16.mxu1 %v3165_v52  ;;  %v3169_v53 = vpack.c.bf16 %v4068_v57, %v4064_v17 }
 0x4a5   :  { %v4074_v7 = vpop.eup %3239  ;;  %3168 = vmatpush3.bf16.msra.mxu1 %v3165_v52 }
 0x4a6   :  { %3170 = vmatprep.subr.bf16.mxu1 %v3169_v53  ;;  %v4076_v60 = vpop.eup %3241  ;;  %v3173_v11 = vpack.c.bf16 %v4074_v7, %v4070_v54 }
 0x4a7   :  { %v4080_v48 = vpop.eup %3243 }
 0x4a8   :  { %v3177_v18 = vpack.c.bf16 %v4080_v48, %v4076_v60 }
 0x4a9   :  { %3172 = vmatpush3.bf16.msra.mxu1 %v3169_v53 }
 0x4aa   :  { %3174 = vmatprep.subr.bf16.mxu1 %v3173_v11 }
 0x4ad   :  { %3176 = vmatpush3.bf16.msra.mxu1 %v3173_v11 }
 0x4ae   :  { %3178 = vmatprep.subr.bf16.mxu1 %v3177_v18 }
 0x4b1   :  { %3180 = vmatpush3.bf16.msra.mxu1 %v3177_v18 }
 0x4b4   :  { %3040 = vmatmul.mubr.msk.f32.vlgmr.msra.gmra.mrb[24].mxu1 %vm1718_vm3, %v4089_v16 }
 0x4b5   :  { %3046 = vmatprep.mubr.msk.f32.mxu1 %vm1800_vm8, %v2711_v14 }
 0x587   :  { %v3041_v25 = vpop.f32.mrb[24].mxu1 }
 0x588   :  { %v1791_v30 = vpop.f32.mrb[25].mxu1 }
 0x589   :  { %v3181_v37 = vpack.c.bf16 %v3041_v25, %v1791_v30  ;;  %v1171_v25 = vmul.f32 %v3842_v28, %v4000_v58  ;;  %v1176_v58 = vmul.f32 %v4016_v44, %v3875_v10  ;;  %v1177_v10 = vmul.f32 %v3879_v13, %v4030_v19  ;;  %v2175_v13 = vld [vmem:[%s4255_s21 + $0x8] sm:$0xff]  ;;  %v2176_v19 = vld [vmem:[%s4255_s21 + $0x10] sm:$0xff] }
 0x58b   :  { %3182 = vmatprep.subr.bf16.mxu1 %v3181_v37 }
 0x58c   :  { %3184 = vmatpush3.bf16.msra.mxu1 %v3181_v37 }
 0x58f   :  { %3047 = vmatmul.mubr.msk.f32.vlgmr.msra.gmra.mrb[26].mxu1 %vm1800_vm8, %v2712_v22 }
 0x590   :  { %3049 = vmatprep.mubr.msk.f32.mxu1 %vm1800_vm8, %v2713_v45 }
 0x593   :  { %3050 = vmatmul.mubr.msk.f32.gmra.mrb[28].mxu1 %vm1800_vm8, %v2714_v47 }
 0x594   :  { %3052 = vmatprep.mubr.msk.f32.mxu1 %vm1800_vm8, %v2715_v33 }
 0x597   :  { %3053 = vmatmul.mubr.msk.f32.gmra.mrb[30].mxu1 %vm1800_vm8, %v2716_v50 }
 0x598   :  { %3055 = vmatprep.mubr.msk.f32.mxu1 %vm1800_vm8, %v2717_v2 }
 0x59b   :  { %3056 = vmatmul.mubr.msk.f32.gmra.mrb[32].mxu1 %vm1800_vm8, %v2718_v56 }
 0x59c   :  { %3088 = vmatprep.mubr.msk.f32.mxu1 %vm1718_vm3, %v4046_v42 }
 0x662   :  { %v3048_v6 = vpop.f32.mrb[26].mxu1 }
 0x663   :  { %3245 = vrcp.f32 %v3048_v6  ;;  %v1891_v5 = vpop.f32.mrb[27].mxu1 }
 0x664   :  { %3247 = vrcp.f32 %v1891_v5 }
 0x666   :  { %v3051_v8 = vpop.f32.mrb[28].mxu1 }
 0x667   :  { %3249 = vrcp.f32 %v3051_v8  ;;  %v1901_v3 = vpop.f32.mrb[29].mxu1  ;;  %v1178_v8 = vmul.f32 %v4025_v1, %v3869_v63  ;;  %v2174_v63 = vld [vmem:[%s4255_s21] sm:$0xff] }
 0x668   :  { %3251 = vrcp.f32 %v1901_v3  ;;  %v3201_v1 = vpack.c.bf16 %v2175_v13, %v2174_v63 }
 0x66a   :  { %v3054_v40 = vpop.f32.mrb[30].mxu1 }
 0x66b   :  { %3253 = vrcp.f32 %v3054_v40  ;;  %v1911_v24 = vpop.f32.mrb[31].mxu1 }
 0x66c   :  { %3255 = vrcp.f32 %v1911_v24 }
 0x66d   :  { %v3246_v42 = vpop.eup %3245 }
 0x66e   :  { %v3248_v36 = vpop.eup %3247  ;;  %v3057_v55 = vpop.f32.mrb[32].mxu1  ;;  %v1933_v34 = vmul.f32 %v3246_v42, %v4062_v26 }
 0x66f   :  { %3257 = vrcp.f32 %v3057_v55  ;;  %v1921_v49 = vpop.f32.mrb[33].mxu1  ;;  %v1931_v35 = vmul.f32 %v3248_v36, %v4060_v0 }
 0x670   :  { %3259 = vrcp.f32 %v1921_v49 }
 0x671   :  { %v3250_v9 = vpop.eup %3249  ;;  %3060 = vmatprep.mubr.msk.f32.mxu0 %vm1672_vm6, %v1931_v35 }
 0x672   :  { %v3252_v52 = vpop.eup %3251  ;;  %3061 = vmatmul.mubr.msk.f32.vlgmr.msra.gmra.mrb[32].mxu0 %vm1672_vm6, %v1933_v34  ;;  %v1937_v11 = vmul.f32 %v3250_v9, %v4068_v57  ;;  %v2177_v9 = vld [vmem:[%s4255_s21 + $0x18] sm:$0xff] }
 0x673   :  { %v1935_v53 = vmul.f32 %v3252_v52, %v4064_v17 }
 0x675   :  { %v3254_v18 = vpop.eup %3253  ;;  %3063 = vmatprep.mubr.msk.f32.mxu0 %vm1672_vm6, %v1935_v53 }
 0x676   :  { %v3256_v61 = vpop.eup %3255  ;;  %3064 = vmatmul.mubr.msk.f32.gmra.mrb[34].mxu0 %vm1672_vm6, %v1937_v11  ;;  %v1941_v26 = vmul.f32 %v3254_v18, %v4074_v7  ;;  %v4136_v7 = vld [vmem:[%s4291_s30] sm:$0xff] }
 0x677   :  { %v1939_v0 = vmul.f32 %v3256_v61, %v4070_v54  ;;  %v2302_v54 = vld [vmem:[%s4257_s23] sm:$0x3]  ;;  %2283 = vperm.xlu1 %3225, %v4136_v7  }
 0x678   :  { %3102 = vmatprep.subr.msk.mxu0 %vm1333_vm1, %v2302_v54 }
 0x679   :  { %v3258_v20 = vpop.eup %3257  ;;  %3066 = vmatprep.mubr.msk.f32.mxu0 %vm1672_vm6, %v1939_v0  ;;  %3103 = vmatpush3.msk.msra.mxu0 %vm1333_vm1, %v2302_v54 }
 0x67a   :  { %v3260_v14 = vpop.eup %3259  ;;  %3067 = vmatmul.mubr.msk.f32.gmra.mrb[36].mxu0 %vm1672_vm6, %v1941_v26  ;;  %v1945_v57 = vmul.f32 %v3258_v20, %v4080_v48  ;;  %v1284_v48 = vpop.permute.xlu1 %1283 }
 0x67b   :  { %v1943_v17 = vmul.f32 %v3260_v14, %v4076_v60  ;;  %3227 = vset.pattern.permute.xlu1 %v3306_v39  ;;  %v1286_v60 = vpop.permute.xlu0 %1285  ;;  %v1307_v23 = vadd.f32 %v1284_v48, %v1171_v25 }
 0x67c   :  { %2270 = vperm.xlu1 %3227, %v4136_v7   ;;  %v1308_v30 = vadd.f32 %v1286_v60, %v1172_v21 }
 0x67d   :  { %3069 = vmatprep.mubr.msk.f32.mxu0 %vm1672_vm6, %v1943_v17 }
 0x67e   :  { %3070 = vmatmul.mubr.msk.f32.gmra.mrb[38].mxu0 %vm1672_vm6, %v1945_v57  ;;  %v1288_v37 = vpop.permute.xlu1 %1287 }
 0x67f   :  { %3104 = vmatprep.mubr.msk.f32.mxu0 %vm1316_vm2, %v4136_v7  ;;  %v1290_v27 = vpop.permute.xlu0 %1289  ;;  %v1309_v32 = vadd.f32 %v1288_v37, %v1173_v46  ;;  %v2740_v46 = vld [vmem:[%s4256_s22] ss:$0 sm:$0xff] }
 0x680   :  { %2275 = vperm.xlu1 %3227, %v4141_v38   ;;  %v1310_v12 = vadd.f32 %v1290_v27, %v1174_v29 }
 0x682   :  { %3105 = vmatmul.mubr.msk.f32.vlgmr.msra.gmra.mrb[40].mxu0 %vm1316_vm2, %v4141_v38  ;;  %v1292_v43 = vpop.permute.xlu1 %1291 }
 0x683   :  { %3114 = vmatprep.mubr.msk.f32.mxu0 %vm1316_vm2, %v4136_v7  ;;  %v1294_v47 = vpop.permute.xlu0 %1293  ;;  %v1311_v41 = vadd.f32 %v1292_v43, %v1175_v31  ;;  %v2476_v43 = vld [vmem:[%s4259_s25] sm:$0x3]  ;;  %s4292_s25 = sld [smem:[#allocation13_spill]] }
 0x684   :  { %v1312_v62 = vadd.f32 %v1294_v47, %v1176_v58  ;;  %3112 = vmatprep.subr.msk.mxu0 %vm1333_vm1, %v2476_v43 }
 0x685   :  { %3113 = vmatpush3.msk.msra.mxu0 %vm1333_vm1, %v2476_v43 }
 0x686   :  { %v1296_v3 = vpop.permute.xlu1 %1295  ;;  %3115 = vmatmul.mubr.msk.f32.vlgmr.msra.gmra.mrb[42].mxu0 %vm1316_vm2, %v4141_v38 }
 0x687   :  { %v1298_v4 = vpop.permute.xlu0 %1297  ;;  %v1313_v15 = vadd.f32 %v1296_v3, %v1177_v10 }
 0x688   :  { %v1314_v59 = vadd.f32 %v1298_v4, %v1178_v8 }
 0x745   :  { %v3062_v22 = vpop.f32.mrb[32].mxu0 }
 0x746   :  { %v2081_v45 = vmul.f32 %v3062_v22, %v1308_v30  ;;  %v2041_v39 = vpop.f32.mrb[33].mxu0 }
 0x747   :  { %v2080_v33 = vmul.f32 %v2041_v39, %v1307_v23 }
 0x749   :  { %v3185_v50 = vpack.c.bf16 %v2081_v45, %v2080_v33  ;;  %v3065_v28 = vpop.f32.mrb[34].mxu0  ;;  %v2288_v33 = vpop.permute.xlu0 %2287 }
 0x74a   :  { %v2083_v2 = vmul.f32 %v3065_v28, %v1310_v12  ;;  %v2051_v56 = vpop.f32.mrb[35].mxu0  ;;  %v2397_v12 = vld [vmem:[%s4258_s24] sm:$0x3]  ;;  %v2284_v28 = vpop.permute.xlu1 %2283 }
 0x74b   :  { %v2082_v51 = vmul.f32 %v2051_v56, %v1309_v32  ;;  %3186 = vmatprep.subr.bf16.mxu1 %v3185_v50 }
 0x74c   :  { %3188 = vmatpush3.bf16.msra.mxu1 %v3185_v50 }
 0x74d   :  { %v3189_v6 = vpack.c.bf16 %v2083_v2, %v2082_v51  ;;  %v3068_v5 = vpop.f32.mrb[36].mxu0 }
 0x74e   :  { %v2085_v40 = vmul.f32 %v3068_v5, %v1312_v62  ;;  %v2061_v24 = vpop.f32.mrb[37].mxu0  ;;  %v2271_v56 = vpop.permute.xlu1 %2270  ;;  %v2556_v5 = vld [vmem:[%s4292_s25 + $0x8] sm:$0xff] }
 0x74f   :  { %v2084_v44 = vmul.f32 %v2061_v24, %v1311_v41  ;;  %3190 = vmatprep.subr.bf16.mxu1 %v3189_v6 }
 0x750   :  { %3192 = vmatpush3.bf16.msra.mxu1 %v3189_v6 }
 0x751   :  { %v3193_v42 = vpack.c.bf16 %v2085_v40, %v2084_v44  ;;  %v3071_v36 = vpop.f32.mrb[38].mxu0 }
 0x752   :  { %v2087_v55 = vmul.f32 %v3071_v36, %v1314_v59  ;;  %v2071_v49 = vpop.f32.mrb[39].mxu0  ;;  %v2276_v31 = vpop.permute.xlu1 %2275 }
 0x753   :  { %v2086_v35 = vmul.f32 %v2071_v49, %v1313_v15  ;;  %3194 = vmatprep.subr.bf16.mxu1 %v3193_v42 }
 0x754   :  { %3196 = vmatpush3.bf16.msra.mxu1 %v3193_v42 }
 0x755   :  { %v3197_v34 = vpack.c.bf16 %v2087_v55, %v2086_v35  ;;  %v3106_v52 = vpop.f32.mrb[40].mxu0 }
 0x756   :  { %v2747_v53 = vmul.f32 -1.442695, %v3106_v52  ;;  %v2376_v11 = vpop.f32.mrb[41].mxu0 }
 0x757   :  { %3198 = vmatprep.subr.bf16.mxu1 %v3197_v34  ;;  %v2746_v18 = vmul.f32 -1.442695, %v2376_v11 }
 0x758   :  { %3200 = vmatpush3.bf16.msra.mxu1 %v3197_v34  ;;  %3261 = vpow2.f32 %v2747_v53 }
 0x759   :  { %3202 = vmatprep.subr.bf16.mxu1 %v3201_v1  ;;  %3263 = vpow2.f32 %v2746_v18 }
 0x75b   :  { %3089 = vmatmul.mubr.msk.f32.vlgmr.msra.gmra.mrb[34].mxu1 %vm1718_vm3, %v4089_v16  ;;  %v3205_v16 = vpack.c.bf16 %v2177_v9, %v2176_v19 }
 0x75c   :  { %3204 = vmatpush3.bf16.msra.mxu1 %v3201_v1 }
 0x75d   :  { %3206 = vmatprep.subr.bf16.mxu1 %v3205_v16 }
 0x760   :  { %3208 = vmatpush3.bf16.msra.mxu1 %v3205_v16 }
 0x761   :  { %3107 = vmatprep.subr.msk.mxu1 %vm1333_vm1, %v2397_v12 }
 0x762   :  { %v3262_v61 = vpop.eup %3261 }
 0x763   :  { %v3264_v0 = vpop.eup %3263  ;;  %v2392_v26 = vadd.f32 1.0, %v3262_v61 }
 0x764   :  { %v2391_v20 = vadd.f32 1.0, %v3264_v0  ;;  %v3116_v0 = vpop.f32.mrb[42].mxu0 }
 0x765   :  { %3265 = vrcp.f32 %v2392_v26  ;;  %v2546_v26 = vpop.f32.mrb[43].mxu0 }
 0x766   :  { %3267 = vrcp.f32 %v2391_v20 }
 0x76f   :  { %v3266_v14 = vpop.eup %3265 }
 0x770   :  { %v3268_v17 = vpop.eup %3267  ;;  %2564 = vperm.xlu1 %3227, %v3266_v14   ;;  %v2570_v54 = vsub.f32 1.0, %v3266_v14 }
 0x771   :  { %v2569_v57 = vsub.f32 1.0, %v3268_v17  ;;  %2559 = vperm.xlu0 %3228, %v3268_v17  }
 0x774   :  { %2573 = vperm.xlu1 %3227, %v2569_v57  }
 0x775   :  { %2578 = vperm.xlu0 %3228, %v2570_v54  }
 0x7ef   :  { %v2565_v62 = vpop.permute.xlu1 %2564 }
 0x7f0   :  { %v2560_v51 = vpop.permute.xlu0 %2559 }
 0x7f3   :  { %v2574_v4 = vpop.permute.xlu1 %2573 }
 0x7f4   :  { %v2579_v41 = vpop.permute.xlu0 %2578 }
 0x7f5   :  { %v2582_v44 = vmul.f32 %v2579_v41, %v2556_v5 }
 0x82e   :  { %v3090_v60 = vpop.f32.mrb[34].mxu1 }
 0x82f   :  { %v2167_v48 = vmul.f32 0.70710677, %v3090_v60  ;;  %v2154_v21 = vpop.f32.mrb[35].mxu1  ;;  %v2164_v29 = vmul.f32 0.5, %v3090_v60 }
 0x830   :  { %v2166_v25 = vmul.f32 0.70710677, %v2154_v21  ;;  %v2163_v23 = vmul.f32 0.5, %v2154_v21 }
 0x831   :  { %3269 = verf.f32 %v2167_v48 }
 0x832   :  { %3271 = verf.f32 %v2166_v25 }
 0x83b   :  { %v3270_v27 = vpop.eup %3269 }
 0x83c   :  { %v3272_v30 = vpop.eup %3271  ;;  %v2171_v37 = vadd.f32 1.0, %v3270_v27 }
 0x83d   :  { %v2170_v22 = vadd.f32 1.0, %v3272_v30 }
 0x83e   :  { %v2173_v39 = vmul.f32 %v2171_v37, %v2164_v29 }
 0x83f   :  { %v2172_v45 = vmul.f32 %v2170_v22, %v2163_v23 }
 0x841   :  { %3099 = vmatprep.mubr.msk.f32.mxu1 %vm104_vm0, %v2172_v45 }
 0x842   :  { %3100 = vmatmul.mubr.msk.f32.vlgmr.msra.gmra.mrb[36].mxu1 %vm104_vm0, %v2173_v39 }
 0x843   :  { %3109 = vmatprep.mubr.msk.f32.mxu1 %vm1316_vm2, %v4136_v7  ;;  %3108 = vmatpush3.msk.msra.mxu1 %vm1333_vm1, %v2397_v12 }
 0x846   :  { %3110 = vmatmul.mubr.msk.f32.vlgmr.msra.gmra.mrb[38].mxu1 %vm1316_vm2, %v4141_v38  ;;  %v2555_v38 = vld [vmem:[%s4292_s25] sm:$0xff] }
 0x847   :  { %v2581_v15 = vmul.f32 %v2574_v4, %v2555_v38 }
 0x915   :  { %v3101_v47 = vpop.f32.mrb[36].mxu1 }
 0x916   :  { %v2263_v32 = vadd.f32 %v3101_v47, %v2740_v46  ;;  %v2257_v50 = vpop.f32.mrb[37].mxu1 }
 0x917   :  { %v2258_v7 = vadd.f32 %v2740_v46, %v2257_v50 }
 0x918   :  { %v2291_v58 = vmul.f32 %v2288_v33, %v2263_v32  ;;  %v2279_v6 = vmul.f32 %v2276_v31, %v2263_v32 }
 0x919   :  { %v2290_v2 = vmul.f32 %v2284_v28, %v2258_v7  ;;  %v2278_v3 = vmul.f32 %v2271_v56, %v2258_v7  ;;  %v3111_v18 = vpop.f32.mrb[38].mxu1 }
 0x91a   :  { %2296 = vrot.lane.b32.xlu0 %v2291_v58, %s3307_s16  ;;  %v2467_v61 = vpop.f32.mrb[39].mxu1 }
 0x91b   :  { %2294 = vrot.lane.b32.xlu1 %v2290_v2, %s3307_s16  ;;  %s3310_s16 = smov [#allocation2]  }
 0x91c   :  { %s2637_s28 = sshll.u32 %s3310_s16, 4  ;;  %s2638_s28 = int_to_ptr.vmem [resolvable:$true] %s2637_s28 }
 0x91d   :  { %s3281_s8 = scalar_lea.vmem %s2638_s28, 256  ;;  %p3286_p1 = scmp.lt.s32.totalorder %s2638_s28, %s2638_s28 }
 0x91e   :  { %p3282_p0 = scmp.ne.s32.totalorder %s2638_s28, %s3281_s8  ;;  %p3287_p2 = scmp.lt.s32.totalorder %s3281_s8, %s3281_s8 }
 0x920   :  { %p3288_p3 = por %p3287_p2, %p3286_p1 }
 0x922   :  { %p3289_p4 = pnand %p3288_p3, %p3282_p0 }
 0x98c   :  { %v2297_v8 = vpop.permute.xlu0 %2296 }
 0x98d   :  { %v2301_v40 = vadd.f32 %v2297_v8, %v2279_v6  ;;  %v2295_v24 = vpop.permute.xlu1 %2294 }
 0x98e   :  { %v2300_v10 = vadd.f32 %v2295_v24, %v2278_v3 }
 0x98f   :  { %v2568_v59 = vmul.f32 %v2565_v62, %v2301_v40 }
 0x990   :  { %v2567_v42 = vmul.f32 %v2560_v51, %v2300_v10 }
 0x991   :  { %v2584_v36 = vadd.f32 %v2582_v44, %v2568_v59 }
 0x992   :  { %v2583_v55 = vadd.f32 %v2581_v15, %v2567_v42 }
 0x993   :  { %v2588_v49 = vsel %vm104_vm0, %v2584_v36, 0.0 }
 0x994   :  { %2589 = vadd.xlane.f32.xlu0 %v2588_v49  ;;  %v2585_v35 = vsel %vm104_vm0, %v2583_v55, 0.0 }
 0x995   :  { %2586 = vadd.xlane.f32.xlu1 %v2585_v35 }
 0xa21   :  { %v2590_v34 = vpop.xlane.xlu0 %2589 }
 0xa22   :  { %v2593_v63 = vmul.f32 0.03125, %v2590_v34  ;;  %v2587_v13 = vpop.xlane.xlu1 %2586 }
 0xa23   :  { %v2592_v1 = vmul.f32 0.03125, %v2587_v13 }
 0xa24   :  { %v2595_v19 = vsub.f32 %v2584_v36, %v2593_v63 }
 0xa25   :  { %v2594_v9 = vsub.f32 %v2583_v55, %v2592_v1 }
 0xa26   :  { %v2597_v16 = vmul.f32 %v2595_v19, %v2595_v19 }
 0xa27   :  { %v2596_v52 = vmul.f32 %v2594_v9, %v2594_v9 }
 0xa28   :  { %v2601_v53 = vsel %vm104_vm0, %v2597_v16, 0.0 }
 0xa29   :  { %2602 = vadd.xlane.f32.xlu1 %v2601_v53  ;;  %v2598_v11 = vsel %vm104_vm0, %v2596_v52, 0.0 }
 0xa2a   :  { %2599 = vadd.xlane.f32.xlu0 %v2598_v11 }
 0xab6   :  { %v2603_v20 = vpop.xlane.xlu1 %2602 }
 0xab7   :  { %v2605_v14 = vmul.f32 0.03125, %v2603_v20  ;;  %v2600_v17 = vpop.xlane.xlu0 %2599 }
 0xab8   :  { %v2604_v57 = vmul.f32 0.03125, %v2600_v17 }
 0xab9   :  { %v2607_v54 = vadd.f32 1e-05, %v2605_v14 }
 0xaba   :  { %v2606_v60 = vadd.f32 1e-05, %v2604_v57 }
 0xabb   :  { %3273 = vrsqrt.f32 %v2607_v54  ;;  %vm2617_vm1 = vcmp.eq.f32.partialorder %v2607_v54, inf  ;;  %v2620_v30 = vand.u32 2147483648, %v2607_v54  ;;  %vm2619_vm2 = vcmp.eq.f32.partialorder %v2607_v54, 0.0 }
 0xabc   :  { %3275 = vrsqrt.f32 %v2606_v60  ;;  %vm2610_vm3 = vcmp.eq.f32.partialorder %v2606_v60, inf  ;;  %v2613_v23 = vand.u32 2147483648, %v2606_v60  ;;  %vm2612_vm5 = vcmp.eq.f32.partialorder %v2606_v60, 0.0 }
 0xac5   :  { %v3274_v48 = vpop.eup %3273 }
 0xac6   :  { %v3276_v21 = vpop.eup %3275  ;;  %v2616_v25 = vmul.f32 %v3274_v48, %v2607_v54 }
 0xac7   :  { %v2609_v27 = vmul.f32 %v3276_v21, %v2606_v60 }
 0xac8   :  { %v2618_v37 = vsel %vm2617_vm1, %v2607_v54, %v2616_v25 }
 0xac9   :  { %v2621_v22 = vsel %vm2619_vm2, %v2620_v30, %v2618_v37  ;;  %v2611_v29 = vsel %vm2610_vm3, %v2606_v60, %v2609_v27 }
 0xaca   :  { %3277 = vrcp.f32 %v2621_v22  ;;  %v2614_v45 = vsel %vm2612_vm5, %v2613_v23, %v2611_v29 }
 0xacb   :  { %3279 = vrcp.f32 %v2614_v45 }
 0xad4   :  { %v3278_v39 = vpop.eup %3277 }
 0xad5   :  { %v3280_v46 = vpop.eup %3279  ;;  %v2625_v47 = vmul.f32 %v3278_v39, %v2595_v19 }
 0xad6   :  { %v2623_v33 = vmul.f32 %v3280_v46, %v2594_v9 }
 0xad7   :  { %v2627_v12 = vmul.f32 %v3111_v18, %v2625_v47 }
 0xad8   :  { %v2626_v43 = vmul.f32 %v2623_v33, %v2467_v61 }
 0xad9   :  { %v2629_v32 = vadd.f32 %v3116_v0, %v2627_v12 }
 0xada   :  { %v2628_v50 = vadd.f32 %v2626_v43, %v2546_v26 }
 0xadb   :  { %2631 = vst.msk [vmem:[#allocation2 + $0x8] sm:$0xff] %vm104_vm0, %v2629_v32 }
 0xadc   :  { %2630 = vst.msk [vmem:[#allocation2] sm:$0xff] %vm104_vm0, %v2628_v50 }
 0xadd   :  { %3292 = shalt.err (!%p3289_p4)
}
 0xade   :  { %s3293_s12 = scalar_lea.hbm %s4260_s26, 256 }
 0xadf   :  { %p3294_p5 = scmp.ne.s32.totalorder %s4260_s26, %s3293_s12  ;;  %p3297_p6 = scmp.lt.u32.totalorder %s3293_s12, %s4260_s26 }
 0xae1   :  { %p3299_p7 = pnand %p3297_p6, %p3294_p5 }
 0xae3   :  { %3302 = shalt.err (!%p3299_p7)
}
 0xae4   :  { %s3311_s13 = smov 128   ;;  %s3312_s23 = smov 8  }
 0xae5   :  { %2643 = dma.vmem_to_hbm [thread:$0]  %s2638_s28, 256, %s4260_s26, [#allocation3], %s3311_s13, %s3311_s13, %s3312_s23  }
 0xae6   :  { %3303 = dma.done.wait [#allocation3], 256  }
 0xae7   :  { %3304 = vsyncadd [#allocation3], 4294967040 }
 0xae8   :  { %2647 = vsyncpa [#allocation3], 1 }

</bundles_post_ra>
